<compile_context>
chip_gen: v7x
topology: tpu7x:2x2x1
jax: 0.10.0
libtpu: 0.0.40
codegen_flags: <defaults>
</compile_context>

<pallas_src>
import jax
import jax.numpy as jnp
import numpy as np
from jax.experimental import pallas as pl
from jax.experimental.pallas import tpu as pltpu

EXPANSION = 4
BN_EPS = 1e-5


def _vmem_limit_bytes():
    """~75% of this generation's physical VMEM (v5e/v6e 128MiB->96MiB, v7x 64MiB->48MiB)."""
    try:
        cap = getattr(pltpu.get_tpu_info(), "vmem_capacity_bytes", None)
        if cap:
            return int(cap) * 3 // 4
    except Exception:
        pass
    return 64 * 1024 * 1024


# --------------------------- the fused kernel --------------------------------
def _make_bottleneck_kernel(stride, H, W, Cin, P, Co, has_proj):
    s = stride
    Ho = (H - 1) // s + 1
    Wo = (W - 1) // s + 1
    n_phase = s * s
    border = 2 if s == 1 else 1  # padded-scratch border rows/cols

    def kernel(*refs):
        i = 0
        x_refs = refs[i:i + n_phase]; i += n_phase
        w1_ref, b1_ref, w2_ref, b2_ref, w3_ref, b3_ref = refs[i:i + 6]; i += 6
        ws_ref = None
        if has_proj:
            ws_ref = refs[i]; i += 1
        o_ref = refs[i]; i += 1
        pad_refs = refs[i:i + n_phase]

        w1 = w1_ref[...]
        b1 = b1_ref[...]

        # ---- stage 1: 1x1 conv + BN1 + ReLU (per stride phase) --------------
        # Output goes into a zero-padded f32 VMEM scratch so every 3x3 tap
        # below is a contiguous static slice (no strided loads, no HBM im2col,
        # no XLA-side pad pass).  x is cast f32->bf16 in VMEM.
        x_vals = []
        for p in range(n_phase):
            xv = x_refs[p][...]                                  # (1,Ho,Wo,Cin) f32
            x_vals.append(xv)
            xm = xv.reshape(Ho * Wo, Cin).astype(jnp.bfloat16)
            h1 = jnp.dot(xm, w1, preferred_element_type=jnp.float32) + b1
            h1 = jnp.maximum(h1, 0.0)
            pad_refs[p][...] = jnp.zeros((Ho + border, Wo + border, P), jnp.float32)
            pad_refs[p][1:Ho + 1, 1:Wo + 1, :] = h1.reshape(Ho, Wo, P)

        # ---- stage 2: 3x3 conv (pad=1, stride folded into phases) + BN2 + ReLU
        # 9 taps, each a contiguous static VMEM slice, accumulated into a
        # single f32 register tile (operands never leave VMEM).
        acc2 = jnp.zeros((Ho * Wo, P), jnp.float32)
        for dh in range(3):
            for dw in range(3):
                if s == 1:
                    pref, r0, c0 = pad_refs[0], dh, dw
                else:
                    rp = 0 if dh == 1 else 1   # row parity of the needed phase
                    cp = 0 if dw == 1 else 1
                    r0 = 0 if dh == 0 else 1   # 0 -> uses the zero border row
                    c0 = 0 if dw == 0 else 1
                    pref = pad_refs[rp * 2 + cp]
                t = dh * 3 + dw
                win = pref[r0:r0 + Ho, c0:c0 + Wo, :]            # (Ho,Wo,P) f32
                acc2 = acc2 + jnp.dot(
                    win.reshape(Ho * Wo, P).astype(jnp.bfloat16),
                    w2_ref[t * P:(t + 1) * P, :],
                    preferred_element_type=jnp.float32)
        h2 = jnp.maximum(acc2 + b2_ref[...], 0.0).astype(jnp.bfloat16)

        # ---- stage 3: 1x1 conv + BN3 + shortcut + ReLU (epilogue) ------------
        acc = jnp.dot(h2, w3_ref[...], preferred_element_type=jnp.float32)
        if has_proj:
            # projection shortcut reuses the (even,even) x phase already in VMEM
            xsm = x_vals[0].reshape(Ho * Wo, Cin).astype(jnp.bfloat16)
            acc = acc + jnp.dot(xsm, ws_ref[...], preferred_element_type=jnp.float32)
        else:
            # identity shortcut: residual added in f32 (no bf16 quantization)
            acc = acc + x_vals[0].reshape(Ho * Wo, Co)
        acc = jnp.maximum(acc + b3_ref[...], 0.0)
        o_ref[0, :, :] = acc.astype(o_ref.dtype)

    return kernel, Ho, Wo, n_phase, border


# ------------------------------ glue / params --------------------------------
def fold_bn(bn):
    """Inference-mode BN -> per-channel (scale, shift), both f32 (C,)."""
    gamma, beta, mean, var = bn
    scale = gamma / jnp.sqrt(var + BN_EPS)
    shift = beta - mean * scale
    return scale.astype(jnp.float32), shift.astype(jnp.float32)


def bottleneck_forward(x_nchw, params, stride):
    # NCHW <-> NHWC only at the module boundary (PyTorch interface).
    x = jnp.transpose(x_nchw, (0, 2, 3, 1)).astype(jnp.float32)   # (N,H,W,Cin)
    N, H, W, Cin = x.shape
    P = params["conv1_w"].shape[0]
    Co = EXPANSION * P
    s = int(stride)
    assert s in (1, 2), "TODO(synk): general stride not implemented"
    if s == 2:
        assert H % 2 == 0 and W % 2 == 0, "TODO(synk): odd spatial dims @ stride 2"
    has_proj = (s != 1) or (Cin != Co)

    # Fold inference-mode BN into weight columns (scale) + f32 bias (shift).
    s1, b1 = fold_bn(params["bn1"])
    s2, b2 = fold_bn(params["bn2"])
    s3, b3 = fold_bn(params["bn3"])
    w1 = (params["conv1_w"].reshape(P, Cin).T * s1[None, :]).astype(jnp.bfloat16)
    w2 = (jnp.transpose(params["conv2_w"], (2, 3, 1, 0)).reshape(9 * P, P)
          * s2[None, :]).astype(jnp.bfloat16)      # rows ordered (dh, dw, cin)
    w3 = (params["conv3_w"].reshape(Co, P).T * s3[None, :]).astype(jnp.bfloat16)
    b3_tot = b3
    ws = None
    if has_proj:
        ss, bs = fold_bn(params["sc_bn"])
        ws = (params["sc_w"].reshape(Co, Cin).T * ss[None, :]).astype(jnp.bfloat16)
        b3_tot = b3 + bs

    kernel, Ho, Wo, n_phase, border = _make_bottleneck_kernel(
        s, H, W, Cin, P, Co, has_proj)

    # x delivered per stride phase so every in-kernel tap is a contiguous slice.
    # For stride 1 this is just x; for stride 2 it is the only HBM pre-pass left
    # and the (0,0) phase doubles as the projection-shortcut subsample.
    if s == 1:
        x_phases = [x]
    else:
        x_phases = [x[:, rp::2, cp::2, :] for rp in range(2) for cp in range(2)]

    args = list(x_phases)
    in_specs = [pl.BlockSpec((1, Ho, Wo, Cin), lambda n: (n, 0, 0, 0))
                for _ in range(n_phase)]
    const_ops = [w1, b1.reshape(1, P), w2, b2.reshape(1, P), w3,
                 b3_tot.reshape(1, Co)]
    if has_proj:
        const_ops.append(ws)
    for c in const_ops:
        in_specs.append(pl.BlockSpec(c.shape, lambda n, nd=c.ndim: (0,) * nd))
        args.append(c)

    scratch = [pltpu.VMEM((Ho + border, Wo + border, P), jnp.float32)
               for _ in range(n_phase)]

    out = pl.pallas_call(
        kernel,
        out_shape=jax.ShapeDtypeStruct((N, Ho * Wo, Co), jnp.float32),
        grid=(N,),
        in_specs=in_specs,
        out_specs=pl.BlockSpec((1, Ho * Wo, Co), lambda n: (n, 0, 0)),
        scratch_shapes=scratch,
        compiler_params=pltpu.CompilerParams(
            dimension_semantics=("parallel",),
            vmem_limit_bytes=_vmem_limit_bytes()),
    )(*args)

    out = out.reshape(N, Ho, Wo, Co)
    return jnp.transpose(out, (0, 3, 1, 2))                      # back to NCHW


def init_params(key, in_planes, planes, stride):
    cout = EXPANSION * planes
    keys = jax.random.split(key, 16)

    def bn_params(k, c):
        k1, k2, k3, k4 = jax.random.split(k, 4)
        gamma = jax.random.uniform(k1, (c,), minval=0.5, maxval=1.5)
        beta = 0.1 * jax.random.normal(k2, (c,))
        mean = 0.1 * jax.random.normal(k3, (c,))
        var = jax.random.uniform(k4, (c,), minval=0.5, maxval=1.5)
        return (gamma, beta, mean, var)

    params = {
        "conv1_w": 0.1 * jax.random.normal(keys[0], (planes, in_planes, 1, 1)),
        "bn1": bn_params(keys[1], planes),
        "conv2_w": 0.1 * jax.random.normal(keys[2], (planes, planes, 3, 3)),
        "bn2": bn_params(keys[3], planes),
        "conv3_w": 0.1 * jax.random.normal(keys[4], (cout, planes, 1, 1)),
        "bn3": bn_params(keys[5], cout),
    }
    if stride != 1 or in_planes != cout:
        params["sc_w"] = 0.1 * jax.random.normal(keys[6], (cout, in_planes, 1, 1))
        params["sc_bn"] = bn_params(keys[7], cout)
    return params


# --------------------------- pure-JAX reference -------------------------------
def reference_forward(x_nchw, params, stride):
    x = jnp.transpose(x_nchw, (0, 2, 3, 1)).astype(jnp.float32)

    def conv(inp, w, s, pad):
        return jax.lax.conv_general_dilated(
            inp, jnp.transpose(w, (2, 3, 1, 0)), window_strides=(s, s),
            padding=[(pad, pad), (pad, pad)],
            dimension_numbers=("NHWC", "HWIO", "NHWC"))

    def bn(inp, p):
        sc, sh = fold_bn(p)
        return inp * sc + sh

    out = jax.nn.relu(bn(conv(x, params["conv1_w"], 1, 0), params["bn1"]))
    out = jax.nn.relu(bn(conv(out, params["conv2_w"], stride, 1), params["bn2"]))
    out = bn(conv(out, params["conv3_w"], 1, 0), params["bn3"])
    Cin = x.shape[-1]
    cout = params["conv3_w"].shape[0]
    if stride != 1 or Cin != cout:
        sc = bn(conv(x, params["sc_w"], stride, 0), params["sc_bn"])
    else:
        sc = x
    return jnp.transpose(jax.nn.relu(out + sc), (0, 3, 1, 2))


# ------------------------------------ main ------------------------------------
if __name__ == "__main__":
    key = jax.random.PRNGKey(0)
    fwd = jax.jit(bottleneck_forward, static_argnums=2)

    configs = [
        (16, 8, 2),   # projection shortcut, stride 2 (channel expansion + downsample)
        (32, 8, 1),   # identity shortcut, stride 1 (in_planes == 4*planes)
        (16, 8, 1),   # projection shortcut, stride 1 (channel expansion only)
    ]
    for in_planes, planes, stride in configs:
        key, k1, k2 = jax.random.split(key, 3)
        x = jax.random.normal(k1, (2, in_planes, 16, 16), dtype=jnp.float32)
        p = init_params(k2, in_planes, planes, stride)
        out = jax.block_until_ready(fwd(x, p, stride))
        ref = jax.block_until_ready(reference_forward(x, p, stride))
        np.testing.assert_allclose(np.asarray(out), np.asarray(ref),
                                   rtol=3e-2, atol=3e-2)

    print("KERNEL_OK")
</pallas_src>

<mosaic_0001>
module attributes {stable_mosaic.version = 11 : i64} {
  func.func @kernel(%arg0: i32, %arg1: memref<1x8x8x16xf32, #tpu.memory_space<vmem>>, %arg2: memref<1x8x8x16xf32, #tpu.memory_space<vmem>>, %arg3: memref<1x8x8x16xf32, #tpu.memory_space<vmem>>, %arg4: memref<1x8x8x16xf32, #tpu.memory_space<vmem>>, %arg5: memref<16x8xbf16, #tpu.memory_space<vmem>>, %arg6: memref<1x8xf32, #tpu.memory_space<vmem>>, %arg7: memref<72x8xbf16, #tpu.memory_space<vmem>>, %arg8: memref<1x8xf32, #tpu.memory_space<vmem>>, %arg9: memref<8x32xbf16, #tpu.memory_space<vmem>>, %arg10: memref<1x32xf32, #tpu.memory_space<vmem>>, %arg11: memref<16x32xbf16, #tpu.memory_space<vmem>>, %arg12: memref<1x64x32xf32, #tpu.memory_space<vmem>>, %arg13: memref<9x9x8xf32, #tpu.memory_space<vmem>>, %arg14: memref<9x9x8xf32, #tpu.memory_space<vmem>>, %arg15: memref<9x9x8xf32, #tpu.memory_space<vmem>>, %arg16: memref<9x9x8xf32, #tpu.memory_space<vmem>>) attributes {dimension_semantics = [#tpu.dimension_semantics<parallel>], iteration_bounds = array<i64: 2>, scalar_prefetch = 0 : i64, scratch_operands = 4 : i64, tpu.core_type = #tpu.core_type<tc>, window_params = [{transform_indices = @transform_0, window_bounds = array<i64: 1, 8, 8, 16>}, {transform_indices = @transform_1, window_bounds = array<i64: 1, 8, 8, 16>}, {transform_indices = @transform_2, window_bounds = array<i64: 1, 8, 8, 16>}, {transform_indices = @transform_3, window_bounds = array<i64: 1, 8, 8, 16>}, {pipeline_mode = #tpu.pipeline_mode<synchronous>, transform_indices = @transform_4, window_bounds = array<i64: 16, 8>}, {pipeline_mode = #tpu.pipeline_mode<synchronous>, transform_indices = @transform_5, window_bounds = array<i64: 1, 8>}, {pipeline_mode = #tpu.pipeline_mode<synchronous>, transform_indices = @transform_6, window_bounds = array<i64: 72, 8>}, {pipeline_mode = #tpu.pipeline_mode<synchronous>, transform_indices = @transform_7, window_bounds = array<i64: 1, 8>}, {pipeline_mode = #tpu.pipeline_mode<synchronous>, transform_indices = @transform_8, window_bounds = array<i64: 8, 32>}, {pipeline_mode = #tpu.pipeline_mode<synchronous>, transform_indices = @transform_9, window_bounds = array<i64: 1, 32>}, {pipeline_mode = #tpu.pipeline_mode<synchronous>, transform_indices = @transform_10, window_bounds = array<i64: 16, 32>}, {transform_indices = @transform_11, window_bounds = array<i64: 1, 64, 32>}]} {
    %c0 = arith.constant 0 : index
    %c0_0 = arith.constant 0 : index
    %0 = vector.load %arg5[%c0, %c0_0] : memref<16x8xbf16, #tpu.memory_space<vmem>>, vector<16x8xbf16>
    %c0_1 = arith.constant 0 : index
    %c0_2 = arith.constant 0 : index
    %1 = vector.load %arg6[%c0_1, %c0_2] : memref<1x8xf32, #tpu.memory_space<vmem>>, vector<1x8xf32>
    %c0_3 = arith.constant 0 : index
    %c0_4 = arith.constant 0 : index
    %c0_5 = arith.constant 0 : index
    %c0_6 = arith.constant 0 : index
    %2 = vector.load %arg1[%c0_3, %c0_4, %c0_5, %c0_6] : memref<1x8x8x16xf32, #tpu.memory_space<vmem>>, vector<1x8x8x16xf32>
    %3 = vector.shape_cast %2 : vector<1x8x8x16xf32> to vector<64x16xf32>
    %4 = arith.truncf %3 : vector<64x16xf32> to vector<64x16xbf16>
    %cst = arith.constant dense<0.000000e+00> : vector<64x8xf32>
    %5 = tpu.matmul %4, %0, %cst {dimension_numbers = #tpu.dot_dimension_numbers<[1], [0], [0], [1], [0, 0, 1, 1], [], []>} : vector<64x16xbf16>, vector<16x8xbf16>, vector<64x8xf32> -> vector<64x8xf32>
    %6 = vector.broadcast %1 : vector<1x8xf32> to vector<64x8xf32>
    %7 = arith.addf %5, %6 : vector<64x8xf32>
    %cst_7 = arith.constant 0.000000e+00 : f32
    %8 = vector.broadcast %cst_7 : f32 to vector<64x8xf32>
    %9 = arith.maximumf %7, %8 : vector<64x8xf32>
    %cst_8 = arith.constant 0.000000e+00 : f32
    %10 = vector.broadcast %cst_8 : f32 to vector<9x9x8xf32>
    %c0_9 = arith.constant 0 : index
    %c0_10 = arith.constant 0 : index
    %c0_11 = arith.constant 0 : index
    %11 = vector.load %arg13[%c0_9, %c0_10, %c0_11] : memref<9x9x8xf32, #tpu.memory_space<vmem>>, vector<9x9x8xf32>
    tpu.vector_store %arg13[%c0_9, %c0_10, %c0_11], %10 {strides = array<i32>} : memref<9x9x8xf32, #tpu.memory_space<vmem>>, vector<9x9x8xf32>,
    %12 = vector.shape_cast %9 : vector<64x8xf32> to vector<8x8x8xf32>
    %c1 = arith.constant 1 : index
    %c1_12 = arith.constant 1 : index
    %c0_13 = arith.constant 0 : index
    %13 = vector.load %arg13[%c1, %c1_12, %c0_13] : memref<9x9x8xf32, #tpu.memory_space<vmem>>, vector<8x8x8xf32>
    tpu.vector_store %arg13[%c1, %c1_12, %c0_13], %12 {strides = array<i32>} : memref<9x9x8xf32, #tpu.memory_space<vmem>>, vector<8x8x8xf32>,
    %c0_14 = arith.constant 0 : index
    %c0_15 = arith.constant 0 : index
    %c0_16 = arith.constant 0 : index
    %c0_17 = arith.constant 0 : index
    %14 = vector.load %arg2[%c0_14, %c0_15, %c0_16, %c0_17] : memref<1x8x8x16xf32, #tpu.memory_space<vmem>>, vector<1x8x8x16xf32>
    %15 = vector.shape_cast %14 : vector<1x8x8x16xf32> to vector<64x16xf32>
    %16 = arith.truncf %15 : vector<64x16xf32> to vector<64x16xbf16>
    %cst_18 = arith.constant dense<0.000000e+00> : vector<64x8xf32>
    %17 = tpu.matmul %16, %0, %cst_18 {dimension_numbers = #tpu.dot_dimension_numbers<[1], [0], [0], [1], [0, 0, 1, 1], [], []>} : vector<64x16xbf16>, vector<16x8xbf16>, vector<64x8xf32> -> vector<64x8xf32>
    %18 = vector.broadcast %1 : vector<1x8xf32> to vector<64x8xf32>
    %19 = arith.addf %17, %18 : vector<64x8xf32>
    %cst_19 = arith.constant 0.000000e+00 : f32
    %20 = vector.broadcast %cst_19 : f32 to vector<64x8xf32>
    %21 = arith.maximumf %19, %20 : vector<64x8xf32>
    %cst_20 = arith.constant 0.000000e+00 : f32
    %22 = vector.broadcast %cst_20 : f32 to vector<9x9x8xf32>
    %c0_21 = arith.constant 0 : index
    %c0_22 = arith.constant 0 : index
    %c0_23 = arith.constant 0 : index
    %23 = vector.load %arg14[%c0_21, %c0_22, %c0_23] : memref<9x9x8xf32, #tpu.memory_space<vmem>>, vector<9x9x8xf32>
    tpu.vector_store %arg14[%c0_21, %c0_22, %c0_23], %22 {strides = array<i32>} : memref<9x9x8xf32, #tpu.memory_space<vmem>>, vector<9x9x8xf32>,
    %24 = vector.shape_cast %21 : vector<64x8xf32> to vector<8x8x8xf32>
    %c1_24 = arith.constant 1 : index
    %c1_25 = arith.constant 1 : index
    %c0_26 = arith.constant 0 : index
    %25 = vector.load %arg14[%c1_24, %c1_25, %c0_26] : memref<9x9x8xf32, #tpu.memory_space<vmem>>, vector<8x8x8xf32>
    tpu.vector_store %arg14[%c1_24, %c1_25, %c0_26], %24 {strides = array<i32>} : memref<9x9x8xf32, #tpu.memory_space<vmem>>, vector<8x8x8xf32>,
    %c0_27 = arith.constant 0 : index
    %c0_28 = arith.constant 0 : index
    %c0_29 = arith.constant 0 : index
    %c0_30 = arith.constant 0 : index
    %26 = vector.load %arg3[%c0_27, %c0_28, %c0_29, %c0_30] : memref<1x8x8x16xf32, #tpu.memory_space<vmem>>, vector<1x8x8x16xf32>
    %27 = vector.shape_cast %26 : vector<1x8x8x16xf32> to vector<64x16xf32>
    %28 = arith.truncf %27 : vector<64x16xf32> to vector<64x16xbf16>
    %cst_31 = arith.constant dense<0.000000e+00> : vector<64x8xf32>
    %29 = tpu.matmul %28, %0, %cst_31 {dimension_numbers = #tpu.dot_dimension_numbers<[1], [0], [0], [1], [0, 0, 1, 1], [], []>} : vector<64x16xbf16>, vector<16x8xbf16>, vector<64x8xf32> -> vector<64x8xf32>
    %30 = vector.broadcast %1 : vector<1x8xf32> to vector<64x8xf32>
    %31 = arith.addf %29, %30 : vector<64x8xf32>
    %cst_32 = arith.constant 0.000000e+00 : f32
    %32 = vector.broadcast %cst_32 : f32 to vector<64x8xf32>
    %33 = arith.maximumf %31, %32 : vector<64x8xf32>
    %cst_33 = arith.constant 0.000000e+00 : f32
    %34 = vector.broadcast %cst_33 : f32 to vector<9x9x8xf32>
    %c0_34 = arith.constant 0 : index
    %c0_35 = arith.constant 0 : index
    %c0_36 = arith.constant 0 : index
    %35 = vector.load %arg15[%c0_34, %c0_35, %c0_36] : memref<9x9x8xf32, #tpu.memory_space<vmem>>, vector<9x9x8xf32>
    tpu.vector_store %arg15[%c0_34, %c0_35, %c0_36], %34 {strides = array<i32>} : memref<9x9x8xf32, #tpu.memory_space<vmem>>, vector<9x9x8xf32>,
    %36 = vector.shape_cast %33 : vector<64x8xf32> to vector<8x8x8xf32>
    %c1_37 = arith.constant 1 : index
    %c1_38 = arith.constant 1 : index
    %c0_39 = arith.constant 0 : index
    %37 = vector.load %arg15[%c1_37, %c1_38, %c0_39] : memref<9x9x8xf32, #tpu.memory_space<vmem>>, vector<8x8x8xf32>
    tpu.vector_store %arg15[%c1_37, %c1_38, %c0_39], %36 {strides = array<i32>} : memref<9x9x8xf32, #tpu.memory_space<vmem>>, vector<8x8x8xf32>,
    %c0_40 = arith.constant 0 : index
    %c0_41 = arith.constant 0 : index
    %c0_42 = arith.constant 0 : index
    %c0_43 = arith.constant 0 : index
    %38 = vector.load %arg4[%c0_40, %c0_41, %c0_42, %c0_43] : memref<1x8x8x16xf32, #tpu.memory_space<vmem>>, vector<1x8x8x16xf32>
    %39 = vector.shape_cast %38 : vector<1x8x8x16xf32> to vector<64x16xf32>
    %40 = arith.truncf %39 : vector<64x16xf32> to vector<64x16xbf16>
    %cst_44 = arith.constant dense<0.000000e+00> : vector<64x8xf32>
    %41 = tpu.matmul %40, %0, %cst_44 {dimension_numbers = #tpu.dot_dimension_numbers<[1], [0], [0], [1], [0, 0, 1, 1], [], []>} : vector<64x16xbf16>, vector<16x8xbf16>, vector<64x8xf32> -> vector<64x8xf32>
    %42 = vector.broadcast %1 : vector<1x8xf32> to vector<64x8xf32>
    %43 = arith.addf %41, %42 : vector<64x8xf32>
    %cst_45 = arith.constant 0.000000e+00 : f32
    %44 = vector.broadcast %cst_45 : f32 to vector<64x8xf32>
    %45 = arith.maximumf %43, %44 : vector<64x8xf32>
    %cst_46 = arith.constant 0.000000e+00 : f32
    %46 = vector.broadcast %cst_46 : f32 to vector<9x9x8xf32>
    %c0_47 = arith.constant 0 : index
    %c0_48 = arith.constant 0 : index
    %c0_49 = arith.constant 0 : index
    %47 = vector.load %arg16[%c0_47, %c0_48, %c0_49] : memref<9x9x8xf32, #tpu.memory_space<vmem>>, vector<9x9x8xf32>
    tpu.vector_store %arg16[%c0_47, %c0_48, %c0_49], %46 {strides = array<i32>} : memref<9x9x8xf32, #tpu.memory_space<vmem>>, vector<9x9x8xf32>,
    %48 = vector.shape_cast %45 : vector<64x8xf32> to vector<8x8x8xf32>
    %c1_50 = arith.constant 1 : index
    %c1_51 = arith.constant 1 : index
    %c0_52 = arith.constant 0 : index
    %49 = vector.load %arg16[%c1_50, %c1_51, %c0_52] : memref<9x9x8xf32, #tpu.memory_space<vmem>>, vector<8x8x8xf32>
    tpu.vector_store %arg16[%c1_50, %c1_51, %c0_52], %48 {strides = array<i32>} : memref<9x9x8xf32, #tpu.memory_space<vmem>>, vector<8x8x8xf32>,
    %cst_53 = arith.constant 0.000000e+00 : f32
    %50 = vector.broadcast %cst_53 : f32 to vector<64x8xf32>
    %c0_54 = arith.constant 0 : index
    %c0_55 = arith.constant 0 : index
    %c0_56 = arith.constant 0 : index
    %51 = vector.load %arg16[%c0_54, %c0_55, %c0_56] : memref<9x9x8xf32, #tpu.memory_space<vmem>>, vector<8x8x8xf32>
    %52 = vector.shape_cast %51 : vector<8x8x8xf32> to vector<64x8xf32>
    %53 = arith.truncf %52 : vector<64x8xf32> to vector<64x8xbf16>
    %c0_57 = arith.constant 0 : index
    %c0_58 = arith.constant 0 : index
    %54 = vector.load %arg7[%c0_57, %c0_58] : memref<72x8xbf16, #tpu.memory_space<vmem>>, vector<8x8xbf16>
    %cst_59 = arith.constant dense<0.000000e+00> : vector<64x8xf32>
    %55 = tpu.matmul %53, %54, %cst_59 {dimension_numbers = #tpu.dot_dimension_numbers<[1], [0], [0], [1], [0, 0, 1, 1], [], []>} : vector<64x8xbf16>, vector<8x8xbf16>, vector<64x8xf32> -> vector<64x8xf32>
    %56 = arith.addf %50, %55 : vector<64x8xf32>
    %c0_60 = arith.constant 0 : index
    %c1_61 = arith.constant 1 : index
    %c0_62 = arith.constant 0 : index
    %57 = vector.load %arg15[%c0_60, %c1_61, %c0_62] : memref<9x9x8xf32, #tpu.memory_space<vmem>>, vector<8x8x8xf32>
    %58 = vector.shape_cast %57 : vector<8x8x8xf32> to vector<64x8xf32>
    %59 = arith.truncf %58 : vector<64x8xf32> to vector<64x8xbf16>
    %c8 = arith.constant 8 : index
    %c0_63 = arith.constant 0 : index
    %60 = vector.load %arg7[%c8, %c0_63] : memref<72x8xbf16, #tpu.memory_space<vmem>>, vector<8x8xbf16>
    %cst_64 = arith.constant dense<0.000000e+00> : vector<64x8xf32>
    %61 = tpu.matmul %59, %60, %cst_64 {dimension_numbers = #tpu.dot_dimension_numbers<[1], [0], [0], [1], [0, 0, 1, 1], [], []>} : vector<64x8xbf16>, vector<8x8xbf16>, vector<64x8xf32> -> vector<64x8xf32>
    %62 = arith.addf %56, %61 : vector<64x8xf32>
    %c0_65 = arith.constant 0 : index
    %c1_66 = arith.constant 1 : index
    %c0_67 = arith.constant 0 : index
    %63 = vector.load %arg16[%c0_65, %c1_66, %c0_67] : memref<9x9x8xf32, #tpu.memory_space<vmem>>, vector<8x8x8xf32>
    %64 = vector.shape_cast %63 : vector<8x8x8xf32> to vector<64x8xf32>
    %65 = arith.truncf %64 : vector<64x8xf32> to vector<64x8xbf16>
    %c16 = arith.constant 16 : index
    %c0_68 = arith.constant 0 : index
    %66 = vector.load %arg7[%c16, %c0_68] : memref<72x8xbf16, #tpu.memory_space<vmem>>, vector<8x8xbf16>
    %cst_69 = arith.constant dense<0.000000e+00> : vector<64x8xf32>
    %67 = tpu.matmul %65, %66, %cst_69 {dimension_numbers = #tpu.dot_dimension_numbers<[1], [0], [0], [1], [0, 0, 1, 1], [], []>} : vector<64x8xbf16>, vector<8x8xbf16>, vector<64x8xf32> -> vector<64x8xf32>
    %68 = arith.addf %62, %67 : vector<64x8xf32>
    %c1_70 = arith.constant 1 : index
    %c0_71 = arith.constant 0 : index
    %c0_72 = arith.constant 0 : index
    %69 = vector.load %arg14[%c1_70, %c0_71, %c0_72] : memref<9x9x8xf32, #tpu.memory_space<vmem>>, vector<8x8x8xf32>
    %70 = vector.shape_cast %69 : vector<8x8x8xf32> to vector<64x8xf32>
    %71 = arith.truncf %70 : vector<64x8xf32> to vector<64x8xbf16>
    %c24 = arith.constant 24 : index
    %c0_73 = arith.constant 0 : index
    %72 = vector.load %arg7[%c24, %c0_73] : memref<72x8xbf16, #tpu.memory_space<vmem>>, vector<8x8xbf16>
    %cst_74 = arith.constant dense<0.000000e+00> : vector<64x8xf32>
    %73 = tpu.matmul %71, %72, %cst_74 {dimension_numbers = #tpu.dot_dimension_numbers<[1], [0], [0], [1], [0, 0, 1, 1], [], []>} : vector<64x8xbf16>, vector<8x8xbf16>, vector<64x8xf32> -> vector<64x8xf32>
    %74 = arith.addf %68, %73 : vector<64x8xf32>
    %c1_75 = arith.constant 1 : index
    %c1_76 = arith.constant 1 : index
    %c0_77 = arith.constant 0 : index
    %75 = vector.load %arg13[%c1_75, %c1_76, %c0_77] : memref<9x9x8xf32, #tpu.memory_space<vmem>>, vector<8x8x8xf32>
    %76 = vector.shape_cast %75 : vector<8x8x8xf32> to vector<64x8xf32>
    %77 = arith.truncf %76 : vector<64x8xf32> to vector<64x8xbf16>
    %c32 = arith.constant 32 : index
    %c0_78 = arith.constant 0 : index
    %78 = vector.load %arg7[%c32, %c0_78] : memref<72x8xbf16, #tpu.memory_space<vmem>>, vector<8x8xbf16>
    %cst_79 = arith.constant dense<0.000000e+00> : vector<64x8xf32>
    %79 = tpu.matmul %77, %78, %cst_79 {dimension_numbers = #tpu.dot_dimension_numbers<[1], [0], [0], [1], [0, 0, 1, 1], [], []>} : vector<64x8xbf16>, vector<8x8xbf16>, vector<64x8xf32> -> vector<64x8xf32>
    %80 = arith.addf %74, %79 : vector<64x8xf32>
    %c1_80 = arith.constant 1 : index
    %c1_81 = arith.constant 1 : index
    %c0_82 = arith.constant 0 : index
    %81 = vector.load %arg14[%c1_80, %c1_81, %c0_82] : memref<9x9x8xf32, #tpu.memory_space<vmem>>, vector<8x8x8xf32>
    %82 = vector.shape_cast %81 : vector<8x8x8xf32> to vector<64x8xf32>
    %83 = arith.truncf %82 : vector<64x8xf32> to vector<64x8xbf16>
    %c40 = arith.constant 40 : index
    %c0_83 = arith.constant 0 : index
    %84 = vector.load %arg7[%c40, %c0_83] : memref<72x8xbf16, #tpu.memory_space<vmem>>, vector<8x8xbf16>
    %cst_84 = arith.constant dense<0.000000e+00> : vector<64x8xf32>
    %85 = tpu.matmul %83, %84, %cst_84 {dimension_numbers = #tpu.dot_dimension_numbers<[1], [0], [0], [1], [0, 0, 1, 1], [], []>} : vector<64x8xbf16>, vector<8x8xbf16>, vector<64x8xf32> -> vector<64x8xf32>
    %86 = arith.addf %80, %85 : vector<64x8xf32>
    %c1_85 = arith.constant 1 : index
    %c0_86 = arith.constant 0 : index
    %c0_87 = arith.constant 0 : index
    %87 = vector.load %arg16[%c1_85, %c0_86, %c0_87] : memref<9x9x8xf32, #tpu.memory_space<vmem>>, vector<8x8x8xf32>
    %88 = vector.shape_cast %87 : vector<8x8x8xf32> to vector<64x8xf32>
    %89 = arith.truncf %88 : vector<64x8xf32> to vector<64x8xbf16>
    %c48 = arith.constant 48 : index
    %c0_88 = arith.constant 0 : index
    %90 = vector.load %arg7[%c48, %c0_88] : memref<72x8xbf16, #tpu.memory_space<vmem>>, vector<8x8xbf16>
    %cst_89 = arith.constant dense<0.000000e+00> : vector<64x8xf32>
    %91 = tpu.matmul %89, %90, %cst_89 {dimension_numbers = #tpu.dot_dimension_numbers<[1], [0], [0], [1], [0, 0, 1, 1], [], []>} : vector<64x8xbf16>, vector<8x8xbf16>, vector<64x8xf32> -> vector<64x8xf32>
    %92 = arith.addf %86, %91 : vector<64x8xf32>
    %c1_90 = arith.constant 1 : index
    %c1_91 = arith.constant 1 : index
    %c0_92 = arith.constant 0 : index
    %93 = vector.load %arg15[%c1_90, %c1_91, %c0_92] : memref<9x9x8xf32, #tpu.memory_space<vmem>>, vector<8x8x8xf32>
    %94 = vector.shape_cast %93 : vector<8x8x8xf32> to vector<64x8xf32>
    %95 = arith.truncf %94 : vector<64x8xf32> to vector<64x8xbf16>
    %c56 = arith.constant 56 : index
    %c0_93 = arith.constant 0 : index
    %96 = vector.load %arg7[%c56, %c0_93] : memref<72x8xbf16, #tpu.memory_space<vmem>>, vector<8x8xbf16>
    %cst_94 = arith.constant dense<0.000000e+00> : vector<64x8xf32>
    %97 = tpu.matmul %95, %96, %cst_94 {dimension_numbers = #tpu.dot_dimension_numbers<[1], [0], [0], [1], [0, 0, 1, 1], [], []>} : vector<64x8xbf16>, vector<8x8xbf16>, vector<64x8xf32> -> vector<64x8xf32>
    %98 = arith.addf %92, %97 : vector<64x8xf32>
    %c1_95 = arith.constant 1 : index
    %c1_96 = arith.constant 1 : index
    %c0_97 = arith.constant 0 : index
    %99 = vector.load %arg16[%c1_95, %c1_96, %c0_97] : memref<9x9x8xf32, #tpu.memory_space<vmem>>, vector<8x8x8xf32>
    %100 = vector.shape_cast %99 : vector<8x8x8xf32> to vector<64x8xf32>
    %101 = arith.truncf %100 : vector<64x8xf32> to vector<64x8xbf16>
    %c64 = arith.constant 64 : index
    %c0_98 = arith.constant 0 : index
    %102 = vector.load %arg7[%c64, %c0_98] : memref<72x8xbf16, #tpu.memory_space<vmem>>, vector<8x8xbf16>
    %cst_99 = arith.constant dense<0.000000e+00> : vector<64x8xf32>
    %103 = tpu.matmul %101, %102, %cst_99 {dimension_numbers = #tpu.dot_dimension_numbers<[1], [0], [0], [1], [0, 0, 1, 1], [], []>} : vector<64x8xbf16>, vector<8x8xbf16>, vector<64x8xf32> -> vector<64x8xf32>
    %104 = arith.addf %98, %103 : vector<64x8xf32>
    %c0_100 = arith.constant 0 : index
    %c0_101 = arith.constant 0 : index
    %105 = vector.load %arg8[%c0_100, %c0_101] : memref<1x8xf32, #tpu.memory_space<vmem>>, vector<1x8xf32>
    %106 = vector.broadcast %105 : vector<1x8xf32> to vector<64x8xf32>
    %107 = arith.addf %104, %106 : vector<64x8xf32>
    %cst_102 = arith.constant 0.000000e+00 : f32
    %108 = vector.broadcast %cst_102 : f32 to vector<64x8xf32>
    %109 = arith.maximumf %107, %108 : vector<64x8xf32>
    %110 = arith.truncf %109 : vector<64x8xf32> to vector<64x8xbf16>
    %c0_103 = arith.constant 0 : index
    %c0_104 = arith.constant 0 : index
    %111 = vector.load %arg9[%c0_103, %c0_104] : memref<8x32xbf16, #tpu.memory_space<vmem>>, vector<8x32xbf16>
    %cst_105 = arith.constant dense<0.000000e+00> : vector<64x32xf32>
    %112 = tpu.matmul %110, %111, %cst_105 {dimension_numbers = #tpu.dot_dimension_numbers<[1], [0], [0], [1], [0, 0, 1, 1], [], []>} : vector<64x8xbf16>, vector<8x32xbf16>, vector<64x32xf32> -> vector<64x32xf32>
    %113 = vector.shape_cast %2 : vector<1x8x8x16xf32> to vector<64x16xf32>
    %114 = arith.truncf %113 : vector<64x16xf32> to vector<64x16xbf16>
    %c0_106 = arith.constant 0 : index
    %c0_107 = arith.constant 0 : index
    %115 = vector.load %arg11[%c0_106, %c0_107] : memref<16x32xbf16, #tpu.memory_space<vmem>>, vector<16x32xbf16>
    %cst_108 = arith.constant dense<0.000000e+00> : vector<64x32xf32>
    %116 = tpu.matmul %114, %115, %cst_108 {dimension_numbers = #tpu.dot_dimension_numbers<[1], [0], [0], [1], [0, 0, 1, 1], [], []>} : vector<64x16xbf16>, vector<16x32xbf16>, vector<64x32xf32> -> vector<64x32xf32>
    %117 = arith.addf %112, %116 : vector<64x32xf32>
    %c0_109 = arith.constant 0 : index
    %c0_110 = arith.constant 0 : index
    %118 = vector.load %arg10[%c0_109, %c0_110] : memref<1x32xf32, #tpu.memory_space<vmem>>, vector<1x32xf32>
    %119 = vector.broadcast %118 : vector<1x32xf32> to vector<64x32xf32>
    %120 = arith.addf %117, %119 : vector<64x32xf32>
    %cst_111 = arith.constant 0.000000e+00 : f32
    %121 = vector.broadcast %cst_111 : f32 to vector<64x32xf32>
    %122 = arith.maximumf %120, %121 : vector<64x32xf32>
    %c0_112 = arith.constant 0 : index
    %c0_113 = arith.constant 0 : index
    %c0_114 = arith.constant 0 : index
    %123 = vector.load %arg12[%c0_112, %c0_113, %c0_114] : memref<1x64x32xf32, #tpu.memory_space<vmem>>, vector<1x64x32xf32>
    %124 = vector.shape_cast %123 : vector<1x64x32xf32> to vector<64x32xf32>
    %125 = vector.shape_cast %122 : vector<64x32xf32> to vector<1x64x32xf32>
    tpu.vector_store %arg12[%c0_112, %c0_113, %c0_114], %125 {strides = array<i32>} : memref<1x64x32xf32, #tpu.memory_space<vmem>>, vector<1x64x32xf32>,
    return
  }
  func.func @transform_0(%arg0: i32) -> (i32, i32, i32, i32) {
    %c0_i32 = arith.constant 0 : i32
    %c0_i32_0 = arith.constant 0 : i32
    %c0_i32_1 = arith.constant 0 : i32
    %c0_i32_2 = arith.constant 0 : i32
    return %arg0, %c0_i32, %c0_i32_0, %c0_i32_1 : i32, i32, i32, i32
  }
  func.func @transform_1(%arg0: i32) -> (i32, i32, i32, i32) {
    %c0_i32 = arith.constant 0 : i32
    %c0_i32_0 = arith.constant 0 : i32
    %c0_i32_1 = arith.constant 0 : i32
    %c0_i32_2 = arith.constant 0 : i32
    return %arg0, %c0_i32, %c0_i32_0, %c0_i32_1 : i32, i32, i32, i32
  }
  func.func @transform_2(%arg0: i32) -> (i32, i32, i32, i32) {
    %c0_i32 = arith.constant 0 : i32
    %c0_i32_0 = arith.constant 0 : i32
    %c0_i32_1 = arith.constant 0 : i32
    %c0_i32_2 = arith.constant 0 : i32
    return %arg0, %c0_i32, %c0_i32_0, %c0_i32_1 : i32, i32, i32, i32
  }
  func.func @transform_3(%arg0: i32) -> (i32, i32, i32, i32) {
    %c0_i32 = arith.constant 0 : i32
    %c0_i32_0 = arith.constant 0 : i32
    %c0_i32_1 = arith.constant 0 : i32
    %c0_i32_2 = arith.constant 0 : i32
    return %arg0, %c0_i32, %c0_i32_0, %c0_i32_1 : i32, i32, i32, i32
  }
  func.func @transform_4(%arg0: i32) -> (i32, i32) {
    %c0_i32 = arith.constant 0 : i32
    %c0_i32_0 = arith.constant 0 : i32
    %c0_i32_1 = arith.constant 0 : i32
    return %c0_i32, %c0_i32_0 : i32, i32
  }
  func.func @transform_5(%arg0: i32) -> (i32, i32) {
    %c0_i32 = arith.constant 0 : i32
    %c0_i32_0 = arith.constant 0 : i32
    %c0_i32_1 = arith.constant 0 : i32
    return %c0_i32, %c0_i32_0 : i32, i32
  }
  func.func @transform_6(%arg0: i32) -> (i32, i32) {
    %c0_i32 = arith.constant 0 : i32
    %c0_i32_0 = arith.constant 0 : i32
    %c0_i32_1 = arith.constant 0 : i32
    return %c0_i32, %c0_i32_0 : i32, i32
  }
  func.func @transform_7(%arg0: i32) -> (i32, i32) {
    %c0_i32 = arith.constant 0 : i32
    %c0_i32_0 = arith.constant 0 : i32
    %c0_i32_1 = arith.constant 0 : i32
    return %c0_i32, %c0_i32_0 : i32, i32
  }
  func.func @transform_8(%arg0: i32) -> (i32, i32) {
    %c0_i32 = arith.constant 0 : i32
    %c0_i32_0 = arith.constant 0 : i32
    %c0_i32_1 = arith.constant 0 : i32
    return %c0_i32, %c0_i32_0 : i32, i32
  }
  func.func @transform_9(%arg0: i32) -> (i32, i32) {
    %c0_i32 = arith.constant 0 : i32
    %c0_i32_0 = arith.constant 0 : i32
    %c0_i32_1 = arith.constant 0 : i32
    return %c0_i32, %c0_i32_0 : i32, i32
  }
  func.func @transform_10(%arg0: i32) -> (i32, i32) {
    %c0_i32 = arith.constant 0 : i32
    %c0_i32_0 = arith.constant 0 : i32
    %c0_i32_1 = arith.constant 0 : i32
    return %c0_i32, %c0_i32_0 : i32, i32
  }
  func.func @transform_11(%arg0: i32) -> (i32, i32, i32) {
    %c0_i32 = arith.constant 0 : i32
    %c0_i32_0 = arith.constant 0 : i32
    %c0_i32_1 = arith.constant 0 : i32
    return %arg0, %c0_i32, %c0_i32_0 : i32, i32, i32
  }
}

</mosaic_0001>

<bundles_post_ra>
// kernel: bottleneck_forward.1
= control target key start
LH: loop header
LB: loop body
LE: loop exit
PB: predicated region body
PF: predicated region fallthrough
CT: control target
= control target key end

     0   :  { %s4464_s0 = inlined_call_operand.hbm [shape: f32[2,8,8,16], index: 0, kind: input, shape index: {}]   ;;  %s4465_s1 = inlined_call_operand.hbm [shape: f32[2,8,8,16], index: 1, kind: input, shape index: {}]   ;;  %s4466_s2 = inlined_call_operand.hbm [shape: f32[2,8,8,16], index: 2, kind: input, shape index: {}]   ;;  %s4467_s3 = inlined_call_operand.hbm [shape: f32[2,8,8,16], index: 3, kind: input, shape index: {}]   ;;  %s4468_s4 = inlined_call_operand.hbm [shape: bf16[16,8], index: 4, kind: input, shape index: {}]   ;;  %s4469_s5 = inlined_call_operand.hbm [shape: f32[1,8], index: 5, kind: input, shape index: {}]   ;;  %s4470_s6 = inlined_call_operand.hbm [shape: bf16[72,8], index: 6, kind: input, shape index: {}]   ;;  %s4471_s7 = inlined_call_operand.hbm [shape: f32[1,8], index: 7, kind: input, shape index: {}]   ;;  %s4472_s8 = inlined_call_operand.hbm [shape: bf16[8,32], index: 8, kind: input, shape index: {}]   ;;  %s4473_s9 = inlined_call_operand.hbm [shape: f32[1,32], index: 9, kind: input, shape index: {}]   ;;  %s4474_s10 = inlined_call_operand.hbm [shape: bf16[16,32], index: 10, kind: input, shape index: {}]   ;;  %s4475_s11 = inlined_call_operand.hbm [shape: f32[2,64,32], index: 11, kind: output, shape index: {}]  }
   0x1   :  { %4507 = sst [smem:[#allocation40_spill]] %s4465_s1 }
   0x2   :  { %4508 = sst [smem:[#allocation41_spill]] %s4467_s3 }
   0x3   :  { %4509 = sst [smem:[#allocation42_spill]] %s4468_s4 }
   0x4   :  { %4510 = sst [smem:[#allocation43_spill]] %s4469_s5 }
   0x5   :  { %4511 = sst [smem:[#allocation44_spill]] %s4471_s7 }
   0x6   :  { %4512 = sst [smem:[#allocation45_spill]] %s4473_s9 }
   0x7   :  { %4513 = sst [smem:[#allocation46_spill]] %s4475_s11 }
   0x8   :  { %16 = vsyncpa [#allocation7], 0 }
   0x9   :  { %18 = vsyncpa [#allocation7 + $0x1], 0 }
   0xa   :  { %19 = vsyncpa [#allocation10], 0 }
   0xb   :  { %21 = vsyncpa [#allocation10 + $0x1], 0 }
   0xc   :  { %22 = vsyncpa [#allocation13], 0 }
   0xd   :  { %24 = vsyncpa [#allocation13 + $0x1], 0 }
   0xe   :  { %25 = vsyncpa [#allocation16], 0 }
   0xf   :  { %26 = vsyncpa [#allocation19], 0 }
  0x10   :  { %27 = vsyncpa [#allocation22], 0 }
  0x11   :  { %28 = vsyncpa [#allocation8], 0 }
  0x12   :  { %30 = vsyncpa [#allocation8 + $0x1], 0  ;;  %s3504_s17 = smov 0   ;;  %s3506_s18 = smov 0  }
  0x13   :  { %s3508_s19 = smov 0   ;;  %s3510_s20 = smov 0  }
  0x14 LB: > { %4514 = sst [smem:[#allocation33_spill]] %s3411_s17  ;;  %s3425_s21 = smov [#allocation14]   ;;  %s3423_s20 = sphi %s3510_s20, %s4564_s20   ;;  %s3419_s19 = sphi %s3508_s19, %s4568_s19   ;;  %s3415_s18 = sphi %s3506_s18, %s4567_s18   ;;  %s3411_s17 = sphi %s3504_s17, %s4566_s17  }
  0x15   : > { %s330_s22 = sshll.u32 %s3425_s21, 4  ;;  %s3525_s23 = sadd.s32 4294967295, %s3423_s20   ;;  %s3530_s22 = int_to_ptr.vmem [resolvable:$true] %s330_s22 }
  0x16   : > { %4515 = sst [smem:[#allocation34_spill]] %s3525_s23  ;;  %p2457_p0 = scmp.ge.s32.totalorder %s3423_s20, 1 }
  0x17   : > { %p4479_p1 = scmp.eq.s32.totalorder %s3525_s23, 0  ;;  %p318_p2 = scmp.lt.s32.totalorder %s3423_s20, 3 }
  0x18   : > { %s3426_s25 = smov [#allocation15]   ;;  %s3427_s28 = smov [#allocation18]  }
  0x19   : > { %p3532_p3 = pnand %p2457_p0, %p318_p2  ;;  %s344_s26 = sshll.u32 %s3426_s25, 4  ;;  %s3545_s26 = int_to_ptr.vmem [resolvable:$true] %s344_s26 }
  0x1a   : > { %s368_s29 = sshll.u32 %s3427_s28, 4  ;;  %s4519_s4 = sld [smem:[#allocation42_spill]]  ;;  %s3547_s29 = int_to_ptr.vmem [resolvable:$true] %s368_s29 }
  0x1b   : > { %s4516_s24 = scalar_select %p3532_p3, 1, 0 }
  0x1c   : > { %p2914_p5 = pneg %p3532_p3 }
  0x1d   : > { %4517 = sst [smem:[#allocation35_spill]] %s4516_s24 }
  0x1e   : > { %p3541_p6 = pnand %p2914_p5, %p4479_p1 }
  0x20   : > { %s4518_s27 = scalar_select %p3541_p6, 1, 0 }
  0x21   : > { %s3017_s13 = scalar_lea.hbm %s4519_s4, 128  ;;  %p3557_p8 = pneg %p3541_p6 }
  0x22   : > { %p3018_p7 = scmp.ne.s32.totalorder %s4519_s4, %s3017_s13  ;;  %p3024_p11 = scmp.lt.u32.totalorder %s3017_s13, %s4519_s4 }
  0x23   : > { %s4520_s16 = scalar_select %p3557_p8, 1, 0 }
  0x24   : > { %p3020_p9 = pnand %p3557_p8, %p3018_p7 }
  0x26   : > { %p3021_p10 = pneg %p3020_p9 }
  0x28   : > { %p3026_p12 = pnand %p3024_p11, %p3021_p10 }
  0x2a   : > { %3029 = shalt.err (!%p3026_p12)
}
  0x2b   : > { %s3030_s28 = scalar_lea.vmem %s3530_s22, 128  ;;  %p3038_p5 = scmp.lt.s32.totalorder %s3530_s22, %s3530_s22 }
  0x2c   : > { %p3031_p13 = scmp.ne.s32.totalorder %s3530_s22, %s3030_s28  ;;  %p3039_p4 = scmp.lt.s32.totalorder %s3030_s28, %s3030_s28 }
  0x2e   : > { %p3033_p0 = pnand %p3031_p13, %p3557_p8  ;;  %p3040_p7 = por %p3039_p4, %p3038_p5 }
  0x30   : > { %p3034_p2 = pneg %p3033_p0 }
  0x32   : > { %p3041_p9 = pnand %p3040_p7, %p3034_p2 }
  0x34   : > { %3044 = shalt.err (!%p3041_p9)
}
  0x35   : > { %s4481_s30 = smov 64   ;;  %s4484_s12 = smov 4  }
  0x36   : > { %2917 = dma.hbm_to_vmem [thread:$0]  (!%p3541_p6), %s4519_s4, 128, %s3530_s22, [#allocation13], %s4481_s30, %s4481_s30, %s4484_s12  }
  0x37   : > { %s4521_s5 = sld [smem:[#allocation43_spill]] }
  0x3d   : > { %s3045_s25 = scalar_lea.hbm %s4521_s5, 16 }
  0x3e   : > { %p3046_p4 = scmp.ne.s32.totalorder %s4521_s5, %s3045_s25  ;;  %p3052_p12 = scmp.lt.u32.totalorder %s3045_s25, %s4521_s5 }
  0x40   : > { %p3048_p10 = pnand %p3046_p4, %p3557_p8 }
  0x42   : > { %p3049_p11 = pneg %p3048_p10 }
  0x44   : > { %p3054_p13 = pnand %p3052_p12, %p3049_p11 }
  0x46   : > { %3057 = shalt.err (!%p3054_p13)
}
  0x47   : > { %s3058_s22 = scalar_lea.vmem %s3545_s26, 16  ;;  %s3065_s11 = scalar_lea.vmem %s3545_s26, 32 }
  0x48   : > { %p3059_p0 = scmp.ne.s32.totalorder %s3545_s26, %s3058_s22  ;;  %p3066_p7 = scmp.lt.s32.totalorder %s3545_s26, %s3545_s26 }
  0x49   : > { %p3067_p9 = scmp.lt.s32.totalorder %s3065_s11, %s3058_s22 }
  0x4a   : > { %p3061_p2 = pnand %p3059_p0, %p3557_p8 }
  0x4b   : > { %p3068_p4 = por %p3067_p9, %p3066_p7 }
  0x4c   : > { %p3062_p5 = pneg %p3061_p2 }
  0x4e   : > { %p3069_p10 = pnand %p3068_p4, %p3062_p5 }
  0x50   : > { %3072 = shalt.err (!%p3069_p10)
}
  0x51   : > { %2920 = dma.hbm_to_vmem [thread:$0]  (!%p3541_p6), %s4521_s5, 16, %s3545_s26, [#allocation16]  }
  0x52   : > { %s4522_s7 = sld [smem:[#allocation44_spill]] }
  0x58   : > { %s3073_s15 = scalar_lea.hbm %s4522_s7, 16 }
  0x59   : > { %p3074_p11 = scmp.ne.s32.totalorder %s4522_s7, %s3073_s15  ;;  %p3080_p0 = scmp.lt.u32.totalorder %s3073_s15, %s4522_s7 }
  0x5b   : > { %p3076_p12 = pnand %p3074_p11, %p3557_p8 }
  0x5d   : > { %p3077_p13 = pneg %p3076_p12 }
  0x5f   : > { %p3082_p2 = pnand %p3080_p0, %p3077_p13 }
  0x61   : > { %3085 = shalt.err (!%p3082_p2)
}
  0x62   : > { %s3086_s26 = scalar_lea.vmem %s3547_s29, 16  ;;  %s3093_s11 = scalar_lea.vmem %s3547_s29, 32 }
  0x63   : > { %p3087_p5 = scmp.ne.s32.totalorder %s3547_s29, %s3086_s26  ;;  %p3094_p4 = scmp.lt.s32.totalorder %s3547_s29, %s3547_s29 }
  0x64   : > { %p3095_p10 = scmp.lt.s32.totalorder %s3093_s11, %s3086_s26 }
  0x65   : > { %p3089_p7 = pnand %p3087_p5, %p3557_p8 }
  0x66   : > { %p3096_p11 = por %p3095_p10, %p3094_p4 }
  0x67   : > { %p3090_p9 = pneg %p3089_p7 }
  0x69   : > { %p3097_p12 = pnand %p3096_p11, %p3090_p9 }
  0x6b   : > { %3100 = shalt.err (!%p3097_p12)
}
  0x6c   : > { %2926 = dma.hbm_to_vmem [thread:$0]  (!%p3541_p6), %s4522_s7, 16, %s3547_s29, [#allocation19]  }
  0x6d   : > { %s3430_s13 = smov [#allocation21]   ;;  %s4523_s9 = sld [smem:[#allocation45_spill]] }
  0x6e   : > { %s390_s14 = sshll.u32 %s3430_s13, 4  ;;  %s391_s14 = int_to_ptr.vmem [resolvable:$true] %s390_s14 }
  0x73   : > { %s3101_s25 = scalar_lea.hbm %s4523_s9, 16 }
  0x74   : > { %p3102_p13 = scmp.ne.s32.totalorder %s4523_s9, %s3101_s25  ;;  %p3108_p5 = scmp.lt.u32.totalorder %s3101_s25, %s4523_s9 }
  0x76   : > { %p3104_p0 = pnand %p3102_p13, %p3557_p8 }
  0x78   : > { %p3105_p2 = pneg %p3104_p0 }
  0x7a   : > { %p3110_p7 = pnand %p3108_p5, %p3105_p2 }
  0x7c   : > { %3113 = shalt.err (!%p3110_p7)
}
  0x7d   : > { %s3114_s29 = scalar_lea.vmem %s391_s14, 16  ;;  %s3121_s3 = scalar_lea.vmem %s391_s14, 32 }
  0x7e   : > { %p3115_p9 = scmp.ne.s32.totalorder %s391_s14, %s3114_s29  ;;  %p3122_p11 = scmp.lt.s32.totalorder %s391_s14, %s391_s14 }
  0x7f   : > { %p3123_p12 = scmp.lt.s32.totalorder %s3121_s3, %s3114_s29 }
  0x80   : > { %p3117_p4 = pnand %p3115_p9, %p3557_p8 }
  0x81   : > { %p3124_p1 = por %p3123_p12, %p3122_p11 }
  0x82   : > { %p3118_p10 = pneg %p3117_p4 }
  0x84   : > { %p3125_p3 = pnand %p3124_p1, %p3118_p10 }
  0x86   : > { %3128 = shalt.err (!%p3125_p3)
}
  0x87   : > { %2932 = dma.hbm_to_vmem [thread:$0]  (!%p3541_p6), %s4523_s9, 16, %s391_s14, [#allocation22]  }
  0x88   : > { %s2456_s15 = sadd.s32 4294967294, %s3423_s20   ;;  %s3649_s21 = sadd.s32 1, %s3423_s20  }
  0x89   : > { %4524 = sst [smem:[#allocation36_spill]] %s3649_s21  ;;  %s40_s25 = ssub.s32 %s3423_s20, %s3649_s21 }
  0x8a   : > { %s43_s28 = sadd.s32 1, %s3419_s19  ;;  %p41_p1 = scmp.eq.s32.totalorder %s40_s25, 0 }
  0x8b   : > { %p50_p3 = scmp.ne.s32.totalorder %s3419_s19, %s3415_s18  ;;  %p51_p13 = scmp.eq.s32.totalorder %s3423_s20, 0 }
  0x8c   : > { %p56_p0 = scmp.ne.s32.totalorder %s3415_s18, %s3411_s17  ;;  %p4526_p5 = scmp.eq.s32.totalorder %s3525_s23, 0 }
  0x8d   : > { %s3660_s22 = scalar_select %p41_p1, %s3419_s19, %s43_s28  }
  0x8e   : > { %p52_p2 = por %p51_p13, %p50_p3  ;;  %p3664_p7 = por %p4526_p5, %p56_p0 }
  0x8f   : > { %4525 = sst [smem:[#allocation37_spill]] %s3660_s22  ;;  %p305_p9 = scmp.eq.s32.totalorder %s3525_s23, 1 }
  0x90   : > { %s4527_s14 = scalar_select %p3664_p7, 1, 0 }
  0x91   : > { %p311_p4 = scmp.eq.s32.totalorder %s2456_s15, 1  ;;  %p2960_p10 = scmp.lt.s32.totalorder %s3423_s20, 2 }
  0x92   : > { %s4483_s26 = sand.u32 1, %s3419_s19   ;;  %p3671_p11 = por %p305_p9, %p50_p3 }
  0x93   : > { %p3675_p12 = por %p311_p4, %p56_p0  ;;  %s3681_s3 = sshll.u32 %s4483_s26, 6 }
  0x94   : > { %s4528_s11 = scalar_select %p3671_p11, 1, 0 }
  0x95   : > { %s4530_s29 = scalar_select %p3675_p12, 1, 0 }
  0x96   : > { %4529 = sst [smem:[#allocation38_spill]] %s4528_s11  ;;  %s3684_s24 = sshll.u32 %s3423_s20, 10 }
  0x97   : > { %4531 = sst [smem:[#allocation39_spill]] %s4530_s29  ;;  %p3686_p1 = pnand %p2960_p10, %p52_p2 }
  0x98   : > { %s4487_s15 = sand.u32 1, %s3423_s20   ;;  %s4533_s1 = sld [smem:[#allocation40_spill]] }
  0x99   : > { %s4532_s13 = scalar_select %p3686_p1, 1, 0 }
  0x9a   : > { %s439_s26 = scalar_lea.vmem [#allocation9], %s3681_s3  ;;  %s3702_s4 = scalar_lea.sflag [#allocation10], %s4487_s15 }
  0x9b   : > { %s446_s12 = sshll.u32 %s439_s26, 4  ;;  %p3708_p13 = pneg %p3686_p1  ;;  %s3698_s12 = int_to_ptr.vmem [resolvable:$true] %s446_s12 }
  0x9d   : > { %s4534_s7 = scalar_select %p3708_p13, 1, 0 }
  0x9e   : > { %s3695_s30 = scalar_lea.hbm %s4533_s1, %s3684_s24  ;;  %s3134_s26 = scalar_lea.hbm %s4533_s1, 2048 }
  0x9f   : > { %s3129_s5 = scalar_lea.hbm %s3695_s30, 1024  ;;  %p3135_p5 = scmp.lt.u32.totalorder %s3695_s30, %s4533_s1 }
  0xa0   : > { %p3130_p3 = scmp.ne.s32.totalorder %s3695_s30, %s3129_s5  ;;  %p3136_p9 = scmp.lt.u32.totalorder %s3134_s26, %s3129_s5 }
  0xa1   : > { %p3138_p10 = scmp.lt.u32.totalorder %s3129_s5, %s3695_s30 }
  0xa2   : > { %p3132_p0 = pnand %p3708_p13, %p3130_p3  ;;  %p3137_p4 = por %p3136_p9, %p3135_p5 }
  0xa4   : > { %p3133_p2 = pneg %p3132_p0  ;;  %p3139_p12 = por %p3138_p10, %p3137_p4 }
  0xa6   : > { %p3140_p11 = pnand %p3139_p12, %p3133_p2 }
  0xa8   : > { %3143 = shalt.err (!%p3140_p11)
}
  0xa9   : > { %s3144_s15 = scalar_lea.vmem %s3698_s12, 1024  ;;  %s3431_s25 = smov [#allocation9]  }
  0xaa   : > { %p3145_p3 = scmp.ne.s32.totalorder %s3698_s12, %s3144_s15  ;;  %s3149_s28 = sshll.u32 %s3431_s25, 4  ;;  %s3150_s28 = int_to_ptr.vmem [resolvable:$false] %s3149_s28 }
  0xab   : > { %s3151_s9 = scalar_lea.vmem %s3150_s28, 2048  ;;  %p3152_p6 = scmp.lt.s32.totalorder %s3698_s12, %s3150_s28 }
  0xac   : > { %p3147_p0 = pnand %p3145_p3, %p3708_p13  ;;  %p3153_p8 = scmp.lt.s32.totalorder %s3151_s9, %s3144_s15 }
  0xae   : > { %p3148_p7 = pneg %p3147_p0  ;;  %p3154_p5 = por %p3153_p8, %p3152_p6 }
  0xb0   : > { %p3155_p9 = pnand %p3154_p5, %p3148_p7 }
  0xb2   : > { %3158 = shalt.err (!%p3155_p9)
}
  0xb3   : > { %s4505_s5 = smov 128   ;;  %s3433_s22 = smov 8  }
  0xb4   : > { %2942 = dma.hbm_to_vmem [thread:$0]  (!%p3686_p1), %s3695_s30, 1024, %s3698_s12, %s3702_s4, %s4505_s5, %s4505_s5, %s3433_s22  }
  0xb5   : > { %s3434_s26 = smov [#allocation17]   ;;  %s3435_s28 = smov [#allocation20]  }
  0xb6   : > { %s354_s25 = sshll.u32 %s3434_s26, 4  ;;  %s379_s15 = sshll.u32 %s3435_s28, 4  ;;  %s355_s25 = int_to_ptr.vmem [resolvable:$true] %s354_s25  ;;  %s380_s15 = int_to_ptr.vmem [resolvable:$true] %s379_s15 }
  0xb7   : > { %s3159_s21 = scalar_lea.hbm %s4470_s6, 576  ;;  %p4535_p8 = scmp.ne.s32.totalorder %s4520_s16, 0 }
  0xb8   : > { %p3160_p6 = scmp.ne.s32.totalorder %s4470_s6, %s3159_s21  ;;  %p3166_p12 = scmp.lt.u32.totalorder %s3159_s21, %s4470_s6 }
  0xba   : > { %p3162_p7 = pnand %p3160_p6, %p4535_p8 }
  0xbc   : > { %p3163_p11 = pneg %p3162_p7 }
  0xbe   : > { %p3168_p2 = pnand %p3166_p12, %p3163_p11 }
  0xc0   : > { %3171 = shalt.err (!%p3168_p2)
}
  0xc1   : > { %s3172_s30 = scalar_lea.vmem %s355_s25, 576  ;;  %p3180_p0 = scmp.lt.s32.totalorder %s355_s25, %s355_s25 }
  0xc2   : > { %p3173_p4 = scmp.ne.s32.totalorder %s355_s25, %s3172_s30  ;;  %p3181_p5 = scmp.lt.s32.totalorder %s3172_s30, %s3172_s30 }
  0xc4   : > { %p3175_p10 = pnand %p3173_p4, %p4535_p8  ;;  %p3182_p9 = por %p3181_p5, %p3180_p0 }
  0xc6   : > { %p3176_p3 = pneg %p3175_p10 }
  0xc8   : > { %p3183_p1 = pnand %p3182_p9, %p3176_p3 }
  0xca   : > { %3186 = shalt.err (!%p3183_p1)
}
  0xcb   : > { %p4536_p6 = scmp.ne.s32.totalorder %s4518_s27, 0  ;;  %s4537_s1 = smov 4  }
  0xcc   : > { %s4538_s17 = smov 64   ;;  %s3187_s29 = scalar_lea.hbm %s4472_s8, 64 }
  0xcd   : > { %2923 = dma.hbm_to_vmem [thread:$0]  (!%p4536_p6), %s4470_s6, 576, %s355_s25, [#allocation16], %s4538_s17, %s4538_s17, %s4537_s1  }
  0xce   : > { %p3188_p7 = scmp.ne.s32.totalorder %s4472_s8, %s3187_s29  ;;  %p3194_p12 = scmp.lt.u32.totalorder %s3187_s29, %s4472_s8 }
  0xd0   : > { %p3190_p1 = pnand %p3188_p7, %p4535_p8 }
  0xd2   : > { %p3191_p11 = pneg %p3190_p1 }
  0xd4   : > { %p3196_p2 = pnand %p3194_p12, %p3191_p11 }
  0xd6   : > { %3199 = shalt.err (!%p3196_p2)
}
  0xd7   : > { %s3200_s23 = scalar_lea.vmem %s380_s15, 64  ;;  %p3208_p0 = scmp.lt.s32.totalorder %s380_s15, %s380_s15 }
  0xd8   : > { %p3201_p4 = scmp.ne.s32.totalorder %s380_s15, %s3200_s23  ;;  %p3209_p5 = scmp.lt.s32.totalorder %s3200_s23, %s3200_s23 }
  0xda   : > { %p3203_p10 = pnand %p3201_p4, %p4535_p8  ;;  %p3210_p9 = por %p3209_p5, %p3208_p0 }
  0xdc   : > { %p3204_p3 = pneg %p3203_p10 }
  0xde   : > { %p3211_p13 = pnand %p3210_p9, %p3204_p3 }
  0xe0   : > { %3214 = shalt.err (!%p3211_p13)
}
  0xe1   : > { %2929 = dma.hbm_to_vmem [thread:$0]  (!%p4536_p6), %s4472_s8, 64, %s380_s15, [#allocation19]  }
  0xe2   : > { %s3436_s21 = smov [#allocation23]   ;;  %s3215_s28 = scalar_lea.hbm %s4474_s10, 128 }
  0xe3   : > { %s400_s11 = sshll.u32 %s3436_s21, 4  ;;  %p3216_p7 = scmp.ne.s32.totalorder %s4474_s10, %s3215_s28  ;;  %s401_s11 = int_to_ptr.vmem [resolvable:$true] %s400_s11 }
  0xe4   : > { %p3222_p11 = scmp.lt.u32.totalorder %s3215_s28, %s4474_s10 }
  0xe5   : > { %p3218_p13 = pnand %p3216_p7, %p4535_p8 }
  0xe7   : > { %p3219_p1 = pneg %p3218_p13 }
  0xe9   : > { %p3224_p12 = pnand %p3222_p11, %p3219_p1 }
  0xeb   : > { %3227 = shalt.err (!%p3224_p12)
}
  0xec   : > { %s3228_s15 = scalar_lea.vmem %s401_s11, 128  ;;  %p3236_p3 = scmp.lt.s32.totalorder %s401_s11, %s401_s11 }
  0xed   : > { %p3229_p2 = scmp.ne.s32.totalorder %s401_s11, %s3228_s15  ;;  %p3237_p0 = scmp.lt.s32.totalorder %s3228_s15, %s3228_s15 }
  0xef   : > { %p3231_p4 = pnand %p3229_p2, %p4535_p8  ;;  %p3238_p5 = por %p3237_p0, %p3236_p3 }
  0xf1   : > { %p3232_p10 = pneg %p3231_p4 }
  0xf3   : > { %p3239_p9 = pnand %p3238_p5, %p3232_p10 }
  0xf5   : > { %3242 = shalt.err (!%p3239_p9)
}
  0xf6   : > { %2935 = dma.hbm_to_vmem [thread:$0]  (!%p4536_p6), %s4474_s10, 128, %s401_s11, [#allocation22], %s4538_s17, %s4538_s17, %s4537_s1  }
  0xf7   : > { %s3799_s21 = scalar_lea.hbm %s4464_s0, %s3684_s24  ;;  %s418_s27 = scalar_lea.vmem [#allocation6], %s3681_s3 }
  0xf8   : > { %s425_s29 = sshll.u32 %s418_s27, 4  ;;  %s4539_s26 = sand.u32 1, %s3419_s19   ;;  %s3802_s29 = int_to_ptr.vmem [resolvable:$true] %s425_s29 }
  0xf9   : > { %s3806_s28 = scalar_lea.sflag [#allocation7], %s4539_s26  ;;  %s3243_s9 = scalar_lea.hbm %s3799_s21, 1024 }
  0xfa   : > { %p3244_p8 = scmp.ne.s32.totalorder %s3799_s21, %s3243_s9  ;;  %p4540_p7 = scmp.ne.s32.totalorder %s4534_s7, 0 }
  0xfb   : > { %s3248_s11 = scalar_lea.hbm %s4464_s0, 2048  ;;  %p3249_p1 = scmp.lt.u32.totalorder %s3799_s21, %s4464_s0 }
  0xfc   : > { %p3246_p6 = pnand %p3244_p8, %p4540_p7  ;;  %p3250_p11 = scmp.lt.u32.totalorder %s3248_s11, %s3243_s9 }
  0xfd   : > { %p3252_p2 = scmp.lt.u32.totalorder %s3243_s9, %s3799_s21 }
  0xfe   : > { %p3247_p13 = pneg %p3246_p6  ;;  %p3251_p12 = por %p3250_p11, %p3249_p1 }
 0x100   : > { %p3253_p4 = por %p3252_p2, %p3251_p12 }
 0x102   : > { %p3254_p10 = pnand %p3253_p4, %p3247_p13 }
 0x104   : > { %3257 = shalt.err (!%p3254_p10)
}
 0x105   : > { %s3258_s15 = scalar_lea.vmem %s3802_s29, 1024  ;;  %s3437_s5 = smov [#allocation6]  }
 0x106   : > { %p3259_p3 = scmp.ne.s32.totalorder %s3802_s29, %s3258_s15  ;;  %s3263_s25 = sshll.u32 %s3437_s5, 4  ;;  %s3264_s25 = int_to_ptr.vmem [resolvable:$false] %s3263_s25 }
 0x107   : > { %s3265_s16 = scalar_lea.vmem %s3264_s25, 2048  ;;  %p3266_p9 = scmp.lt.s32.totalorder %s3802_s29, %s3264_s25 }
 0x108   : > { %p3261_p0 = pnand %p3259_p3, %p4540_p7  ;;  %p3267_p8 = scmp.lt.s32.totalorder %s3265_s16, %s3258_s15 }
 0x10a   : > { %p3262_p5 = pneg %p3261_p0  ;;  %p3268_p6 = por %p3267_p8, %p3266_p9 }
 0x10c   : > { %p3269_p1 = pnand %p3268_p6, %p3262_p5 }
 0x10e   : > { %3272 = shalt.err (!%p3269_p1)
}
 0x10f   : > { %p4541_p13 = scmp.ne.s32.totalorder %s4532_s13, 0  ;;  %s4542_s12 = smov 128  }
 0x110   : > { %s3837_s9 = scalar_lea.hbm %s4466_s2, %s3684_s24  ;;  %s460_s1 = scalar_lea.vmem [#allocation11], %s3681_s3 }
 0x111   : > { %2939 = dma.hbm_to_vmem [thread:$0]  (!%p4541_p13), %s3799_s21, 1024, %s3802_s29, %s3806_s28, %s4542_s12, %s4542_s12, %s3433_s22  }
 0x112   : > { %s467_s17 = sshll.u32 %s460_s1, 4  ;;  %s3273_s11 = scalar_lea.hbm %s3837_s9, 1024  ;;  %s3840_s17 = int_to_ptr.vmem [resolvable:$true] %s467_s17 }
 0x113   : > { %p3274_p11 = scmp.ne.s32.totalorder %s3837_s9, %s3273_s11  ;;  %s3278_s29 = scalar_lea.hbm %s4466_s2, 2048 }
 0x114   : > { %p3279_p4 = scmp.lt.u32.totalorder %s3837_s9, %s4466_s2  ;;  %p3280_p10 = scmp.lt.u32.totalorder %s3278_s29, %s3273_s11 }
 0x115   : > { %p3276_p12 = pnand %p3274_p11, %p4540_p7  ;;  %p3282_p0 = scmp.lt.u32.totalorder %s3273_s11, %s3837_s9 }
 0x116   : > { %p3281_p3 = por %p3280_p10, %p3279_p4 }
 0x117   : > { %p3277_p2 = pneg %p3276_p12 }
 0x118   : > { %p3283_p5 = por %p3282_p0, %p3281_p3 }
 0x11a   : > { %p3284_p9 = pnand %p3283_p5, %p3277_p2 }
 0x11c   : > { %3287 = shalt.err (!%p3284_p9)
}
 0x11d   : > { %s3288_s15 = scalar_lea.vmem %s3840_s17, 1024  ;;  %s3438_s5 = smov [#allocation11]  }
 0x11e   : > { %p3289_p8 = scmp.ne.s32.totalorder %s3840_s17, %s3288_s15  ;;  %s3293_s25 = sshll.u32 %s3438_s5, 4  ;;  %s3294_s25 = int_to_ptr.vmem [resolvable:$false] %s3293_s25 }
 0x11f   : > { %s3295_s16 = scalar_lea.vmem %s3294_s25, 2048  ;;  %p3296_p11 = scmp.lt.s32.totalorder %s3840_s17, %s3294_s25 }
 0x120   : > { %p3291_p6 = pnand %p3289_p8, %p4540_p7  ;;  %p3297_p12 = scmp.lt.s32.totalorder %s3295_s16, %s3288_s15 }
 0x122   : > { %p3292_p1 = pneg %p3291_p6  ;;  %p3298_p4 = por %p3297_p12, %p3296_p11 }
 0x124   : > { %p3299_p10 = pnand %p3298_p4, %p3292_p1 }
 0x126   : > { %3302 = shalt.err (!%p3299_p10)
}
 0x127   : > { %2945 = dma.hbm_to_vmem [thread:$0]  (!%p4541_p13), %s3837_s9, 1024, %s3840_s17, %s3702_s4, %s4542_s12, %s4542_s12, %s3433_s22  }
 0x128   : > { %s4543_s1 = sld [smem:[#allocation41_spill]]  ;;  %s481_s30 = scalar_lea.vmem [#allocation12], %s3681_s3 }
 0x129   : > { %s488_s21 = sshll.u32 %s481_s30, 4  ;;  %s4544_s29 = sand.u32 1, %s3423_s20   ;;  %s3874_s21 = int_to_ptr.vmem [resolvable:$true] %s488_s21 }
 0x12a   : > { %s3878_s28 = scalar_lea.sflag [#allocation13], %s4544_s29 }
 0x12e   : > { %s3871_s11 = scalar_lea.hbm %s4543_s1, %s3684_s24  ;;  %s3308_s24 = scalar_lea.hbm %s4543_s1, 2048 }
 0x12f   : > { %s3303_s23 = scalar_lea.hbm %s3871_s11, 1024  ;;  %p3309_p5 = scmp.lt.u32.totalorder %s3871_s11, %s4543_s1 }
 0x130   : > { %p3304_p2 = scmp.ne.s32.totalorder %s3871_s11, %s3303_s23  ;;  %p3310_p9 = scmp.lt.u32.totalorder %s3308_s24, %s3303_s23 }
 0x131   : > { %p3312_p6 = scmp.lt.u32.totalorder %s3303_s23, %s3871_s11 }
 0x132   : > { %p3306_p3 = pnand %p3304_p2, %p4540_p7  ;;  %p3311_p8 = por %p3310_p9, %p3309_p5 }
 0x134   : > { %p3307_p0 = pneg %p3306_p3  ;;  %p3313_p1 = por %p3312_p6, %p3311_p8 }
 0x136   : > { %p3314_p11 = pnand %p3313_p1, %p3307_p0 }
 0x138   : > { %3317 = shalt.err (!%p3314_p11)
}
 0x139   : > { %s3318_s3 = scalar_lea.vmem %s3874_s21, 1024  ;;  %s3439_s5 = smov [#allocation12]  }
 0x13a   : > { %p3319_p12 = scmp.ne.s32.totalorder %s3874_s21, %s3318_s3  ;;  %s3323_s25 = sshll.u32 %s3439_s5, 4  ;;  %s3324_s25 = int_to_ptr.vmem [resolvable:$false] %s3323_s25 }
 0x13b   : > { %s3325_s16 = scalar_lea.vmem %s3324_s25, 2048  ;;  %p3326_p2 = scmp.lt.s32.totalorder %s3874_s21, %s3324_s25 }
 0x13c   : > { %p3321_p4 = pnand %p3319_p12, %p4540_p7  ;;  %p3327_p3 = scmp.lt.s32.totalorder %s3325_s16, %s3318_s3 }
 0x13e   : > { %p3322_p10 = pneg %p3321_p4  ;;  %p3328_p5 = por %p3327_p3, %p3326_p2 }
 0x140   : > { %p3329_p9 = pnand %p3328_p5, %p3322_p10 }
 0x142   : > { %3332 = shalt.err (!%p3329_p9)
}
 0x143   : > { %2948 = dma.hbm_to_vmem [thread:$0]  (!%p4541_p13), %s3871_s11, 1024, %s3874_s21, %s3878_s28, %s4542_s12, %s4542_s12, %s3433_s22  }
 0x144   : > { %s4545_s7 = sld [smem:[#allocation35_spill]] }
 0x14a   : > { %p4546_p7 = scmp.ne.s32.totalorder %s4545_s7, 0 }
 0x14b   : > { %s3908_s27 = sand.u32 (!%p4546_p7), 1, %s3415_s18   ;;  %p4547_p0 = scmp.ne.s32.totalorder (!%p4546_p7), %s4527_s14, 0 }
 0x14c   : > { %500 = sbr.rel (%p4546_p7) target bundleno = 1223 (0x4c7), region = 64  ;;  %s3911_s26 = sshll.u32 (!%p4546_p7), %s3908_s27, 6 }
 0x14d   : > { %s503_s13 = scalar_lea.sflag (!%p4546_p7), [#allocation7], %s3908_s27  ;;  %s3915_s30 = scalar_lea.vmem (!%p4546_p7), [#allocation6], %s3911_s26 }
 0x153   : > { %3378 = dma.done.wait (%p4547_p0), %s503_s13, 1024  }
 0x154   : > { %3380 = vsyncadd (%p4547_p0), %s503_s13, 4294966272  ;;  %s4548_s22 = sld [smem:[#allocation34_spill]]  ;;  %s3923_s21 = scalar_lea.vmem [#allocation9], %s3911_s26 }
 0x15a   : > { %s511_s12 = sand.u32 1, %s4548_s22  }
 0x15b   : > { %s512_s11 = scalar_lea.sflag [#allocation10], %s511_s12 }
 0x15c   : > { %3382 = dma.done.wait (%p4547_p0), %s512_s11, 2048  }
 0x15d   : > { %3384 = vsyncadd (%p4547_p0), %s512_s11, 4294965248  ;;  %s3930_s29 = scalar_lea.vmem [#allocation11], %s3911_s26  ;;  %s530_s28 = scalar_lea.sflag [#allocation13], %s511_s12 }
 0x15e   : > { %s3933_s23 = scalar_lea.vmem [#allocation12], %s3911_s26 }
 0x15f   : > { %3386 = dma.done.wait (%p4547_p0), %s530_s28, 1024  }
 0x160   : > { %3388 = vsyncadd (%p4547_p0), %s530_s28, 4294966272  ;;  %p4549_p13 = scmp.eq.s32.totalorder %s4548_s22, 0 }
 0x162   : > { %3390 = dma.done.wait (%p4549_p13), [#allocation13], 128   ;;  %p4550_p8 = pmov %p4549_p13 }
 0x164   : > { %3392 = vsyncadd (%p4550_p8), [#allocation13], 4294967168  ;;  %p4551_p6 = pmov %p4550_p8 }
 0x166   : > { %3394 = dma.done.wait (%p4551_p6), [#allocation16], 592   ;;  %p4552_p1 = pmov %p4551_p6 }
 0x168   : > { %3396 = vsyncadd (%p4552_p1), [#allocation16], 4294966704  ;;  %p4553_p11 = pmov %p4552_p1 }
 0x169   : > { %p4554_p12 = pmov %p4552_p1 }
 0x16a   : > { %3398 = dma.done.wait (%p4553_p11), [#allocation19], 80  }
 0x16b   : > { %3400 = vsyncadd (%p4554_p12), [#allocation19], 4294967216  ;;  %p4555_p4 = pmov %p4552_p1 }
 0x16c   : > { %p4556_p10 = pmov %p4552_p1 }
 0x16d   : > { %3402 = dma.done.wait (%p4555_p4), [#allocation22], 144  }
 0x16e   : > { %3404 = vsyncadd (%p4556_p10), [#allocation22], 4294967152  ;;  %vm729_vm0 = vcmask 64512   ;;  %vm731_vm1 = vcmask 57344   ;;  %v3440_v0 = vmov 0.0   ;;  %v3015_v1 = vld [vmem:[#allocation14] sm:$0xff]  }
 0x16f   : > { %733 = vst.msk [vmem:[#allocation2 + $0x10] sm:$0xff] %vm729_vm0, %v3440_v0  ;;  %735 = vst.msk [vmem:[#allocation2 + $0x20] sm:$0xff] %vm729_vm0, %v3440_v0  ;;  %v619_v2 = vld [vmem:[%s3915_s30] sm:$0xff]  ;;  %v620_v3 = vld [vmem:[%s3915_s30 + $0x8] sm:$0xff]  ;;  %vm643_vm2 = vcmask 130048   ;;  %2641 = vmatprep.subr.bf16.mxu1 %v3015_v1  ;;  %vm1168_vm3 = vcmask 1043456  }
 0x170   : > { %734 = vst.msk [vmem:[#allocation2 + $0x18] sm:$0x1] %vm731_vm1, %v3440_v0  ;;  %736 = vst.msk [vmem:[#allocation2 + $0x28] sm:$0x1] %vm731_vm1, %v3440_v0  ;;  %v621_v4 = vld [vmem:[%s3915_s30 + $0x10] sm:$0xff]  ;;  %v4094_v5 = vpack.c.bf16 %v620_v3, %v619_v2  ;;  %v622_v6 = vld [vmem:[%s3915_s30 + $0x18] sm:$0xff]  ;;  %2642 = vmatpush3.bf16.msra.mxu1 %v3015_v1 }
 0x171   : > { %737 = vst.msk [vmem:[#allocation2 + $0x30] sm:$0xff] %vm729_vm0, %v3440_v0  ;;  %739 = vst.msk [vmem:[#allocation2 + $0x40] sm:$0xff] %vm729_vm0, %v3440_v0  ;;  %v623_v7 = vld [vmem:[%s3915_s30 + $0x20] sm:$0xff]  ;;  %v624_v8 = vld [vmem:[%s3915_s30 + $0x28] sm:$0xff]  ;;  %v4099_v9 = vpack.c.bf16 %v622_v6, %v621_v4  ;;  %2651 = vmatprep.subr.bf16.mxu1 %v3015_v1  ;;  %vm2228_vm4 = vcmask 261120   ;;  %s614_s14 = scalar_lea.vmem [#allocation24], %s3911_s26 }
 0x172   : > { %738 = vst.msk [vmem:[#allocation2 + $0x38] sm:$0x1] %vm731_vm1, %v3440_v0  ;;  %740 = vst.msk [vmem:[#allocation2 + $0x48] sm:$0x1] %vm731_vm1, %v3440_v0  ;;  %v4101_v10 = vpack.c.bf16 %v624_v8, %v623_v7  ;;  %2643 = vmatprep.mubr.msk.bf16.mxu1 %vm643_vm2, %v4094_v5  ;;  %v625_v11 = vld [vmem:[%s3915_s30 + $0x30] sm:$0xff]  ;;  %v626_v12 = vld [vmem:[%s3915_s30 + $0x38] sm:$0xff] }
 0x173   : > { %741 = vst.msk [vmem:[#allocation2 + $0x50] sm:$0xff] %vm729_vm0, %v3440_v0  ;;  %743 = vst.msk [vmem:[#allocation2 + $0x60] sm:$0xff] %vm729_vm0, %v3440_v0  ;;  %2644 = vmatmul.mubr.msk.bf16.vlgmr.msra.gmra.mrb[0].mxu1 %vm643_vm2, %v4099_v9  ;;  %v758_v13 = vld [vmem:[%s3923_s21] sm:$0xff]  ;;  %v759_v14 = vld [vmem:[%s3923_s21 + $0x8] sm:$0xff]  ;;  %v4113_v15 = vpack.c.bf16 %v626_v12, %v625_v11  ;;  %s2565_s4 = sshll.u32 %s4548_s22, 10  ;;  %s2251_s9 = sshll.u32 %s614_s14, 4  ;;  %s4417_s9 = int_to_ptr.vmem [resolvable:$true] %s2251_s9 }
 0x174   : > { %742 = vst.msk [vmem:[#allocation2 + $0x58] sm:$0x1] %vm731_vm1, %v3440_v0  ;;  %744 = vst.msk [vmem:[#allocation2 + $0x68] sm:$0x1] %vm731_vm1, %v3440_v0  ;;  %2652 = vmatpush3.bf16.msra.mxu1 %v3015_v1  ;;  %2647 = vmatprep.mubr.msk.bf16.mxu1 %vm643_vm2, %v4101_v10  ;;  %v766_v16 = vpack.c.bf16 %v759_v14, %v758_v13  ;;  %v760_v17 = vld [vmem:[%s3923_s21 + $0x10] sm:$0xff]  ;;  %v761_v18 = vld [vmem:[%s3923_s21 + $0x18] sm:$0xff] }
 0x175   : > { %745 = vst.msk [vmem:[#allocation2 + $0x70] sm:$0xff] %vm729_vm0, %v3440_v0  ;;  %747 = vst.msk [vmem:[#allocation2 + $0x80] sm:$0xff] %vm729_vm0, %v3440_v0  ;;  %2661 = vmatprep.subr.bf16.mxu1 %v3015_v1  ;;  %v762_v19 = vld [vmem:[%s3923_s21 + $0x20] sm:$0xff]  ;;  %v763_v20 = vld [vmem:[%s3923_s21 + $0x28] sm:$0xff]  ;;  %v767_v21 = vpack.c.bf16 %v761_v18, %v760_v17  ;;  %s4557_s24 = sld [smem:[#allocation38_spill]]  ;;  %s4558_s3 = sld [smem:[#allocation46_spill]] }
 0x176   : > { %746 = vst.msk [vmem:[#allocation2 + $0x78] sm:$0x1] %vm731_vm1, %v3440_v0  ;;  %748 = vst.msk [vmem:[#allocation2 + $0x88] sm:$0x1] %vm731_vm1, %v3440_v0  ;;  %v768_v22 = vpack.c.bf16 %v763_v20, %v762_v19  ;;  %v764_v23 = vld [vmem:[%s3923_s21 + $0x30] sm:$0xff]  ;;  %v765_v24 = vld [vmem:[%s3923_s21 + $0x38] sm:$0xff] }
 0x177   : > { %857 = vst.msk [vmem:[#allocation3 + $0x10] sm:$0xff] %vm729_vm0, %v3440_v0  ;;  %859 = vst.msk [vmem:[#allocation3 + $0x20] sm:$0xff] %vm729_vm0, %v3440_v0  ;;  %v882_v25 = vld [vmem:[%s3930_s29] sm:$0xff]  ;;  %v883_v26 = vld [vmem:[%s3930_s29 + $0x8] sm:$0xff]  ;;  %v769_v27 = vpack.c.bf16 %v765_v24, %v764_v23  ;;  %s2238_s25 = scalar_lea.sflag [#allocation8], %s3908_s27  ;;  %s3333_s16 = scalar_lea.vmem %s4417_s9, 1024 }
 0x178   : > { %858 = vst.msk [vmem:[#allocation3 + $0x18] sm:$0x1] %vm731_vm1, %v3440_v0  ;;  %860 = vst.msk [vmem:[#allocation3 + $0x28] sm:$0x1] %vm731_vm1, %v3440_v0  ;;  %v890_v28 = vpack.c.bf16 %v883_v26, %v882_v25  ;;  %v884_v29 = vld [vmem:[%s3930_s29 + $0x10] sm:$0xff]  ;;  %v885_v30 = vld [vmem:[%s3930_s29 + $0x18] sm:$0xff]  ;;  %p3334_p2 = scmp.ne.s32.totalorder %s4417_s9, %s3333_s16 }
 0x179   : > { %861 = vst.msk [vmem:[#allocation3 + $0x30] sm:$0xff] %vm729_vm0, %v3440_v0  ;;  %863 = vst.msk [vmem:[#allocation3 + $0x40] sm:$0xff] %vm729_vm0, %v3440_v0  ;;  %v886_v31 = vld [vmem:[%s3930_s29 + $0x20] sm:$0xff]  ;;  %v887_v32 = vld [vmem:[%s3930_s29 + $0x28] sm:$0xff]  ;;  %v891_v33 = vpack.c.bf16 %v885_v30, %v884_v29  ;;  %s3441_s7 = smov [#allocation24]  }
 0x17a   : > { %862 = vst.msk [vmem:[#allocation3 + $0x38] sm:$0x1] %vm731_vm1, %v3440_v0  ;;  %864 = vst.msk [vmem:[#allocation3 + $0x48] sm:$0x1] %vm731_vm1, %v3440_v0  ;;  %v892_v34 = vpack.c.bf16 %v887_v32, %v886_v31  ;;  %v888_v35 = vld [vmem:[%s3930_s29 + $0x30] sm:$0xff]  ;;  %v889_v36 = vld [vmem:[%s3930_s29 + $0x38] sm:$0xff] }
 0x17b   : > { %865 = vst.msk [vmem:[#allocation3 + $0x50] sm:$0xff] %vm729_vm0, %v3440_v0  ;;  %867 = vst.msk [vmem:[#allocation3 + $0x60] sm:$0xff] %vm729_vm0, %v3440_v0  ;;  %2648 = vmatmul.mubr.msk.bf16.gmra.mrb[4].mxu1 %vm643_vm2, %v4113_v15  ;;  %v1006_v37 = vld [vmem:[%s3933_s23] sm:$0xff]  ;;  %v1007_v38 = vld [vmem:[%s3933_s23 + $0x8] sm:$0xff]  ;;  %v893_v39 = vpack.c.bf16 %v889_v36, %v888_v35  ;;  %s4415_s5 = scalar_lea.hbm %s4558_s3, %s2565_s4  ;;  %p4559_p3 = scmp.ne.s32.totalorder %s4557_s24, 0 }
 0x17c   : > { %866 = vst.msk [vmem:[#allocation3 + $0x58] sm:$0x1] %vm731_vm1, %v3440_v0  ;;  %868 = vst.msk [vmem:[#allocation3 + $0x68] sm:$0x1] %vm731_vm1, %v3440_v0  ;;  %2653 = vmatprep.mubr.msk.bf16.mxu1 %vm643_vm2, %v766_v16  ;;  %v1014_v40 = vpack.c.bf16 %v1007_v38, %v1006_v37  ;;  %v1008_v41 = vld [vmem:[%s3933_s23 + $0x10] sm:$0xff]  ;;  %v1009_v42 = vld [vmem:[%s3933_s23 + $0x18] sm:$0xff] }
 0x17d   : > { %869 = vst.msk [vmem:[#allocation3 + $0x70] sm:$0xff] %vm729_vm0, %v3440_v0  ;;  %871 = vst.msk [vmem:[#allocation3 + $0x80] sm:$0xff] %vm729_vm0, %v3440_v0  ;;  %v1010_v43 = vld [vmem:[%s3933_s23 + $0x20] sm:$0xff]  ;;  %v1011_v44 = vld [vmem:[%s3933_s23 + $0x28] sm:$0xff]  ;;  %v1015_v45 = vpack.c.bf16 %v1009_v42, %v1008_v41  ;;  %p3335_p5 = pnand %p3334_p2, %p4559_p3  ;;  %s3337_s26 = sshll.u32 %s3441_s7, 4  ;;  %s3338_s26 = int_to_ptr.vmem [resolvable:$false] %s3337_s26 }
 0x17e   : > { %870 = vst.msk [vmem:[#allocation3 + $0x78] sm:$0x1] %vm731_vm1, %v3440_v0  ;;  %872 = vst.msk [vmem:[#allocation3 + $0x88] sm:$0x1] %vm731_vm1, %v3440_v0  ;;  %v1016_v46 = vpack.c.bf16 %v1011_v44, %v1010_v43  ;;  %v1012_v47 = vld [vmem:[%s3933_s23 + $0x30] sm:$0xff]  ;;  %v1013_v48 = vld [vmem:[%s3933_s23 + $0x38] sm:$0xff]  ;;  %p3340_p7 = scmp.lt.s32.totalorder %s4417_s9, %s3338_s26 }
 0x17f   : > { %979 = vst.msk [vmem:[#allocation4] sm:$0xff] %vm729_vm0, %v3440_v0  ;;  %981 = vst.msk [vmem:[#allocation4 + $0x10] sm:$0xff] %vm729_vm0, %v3440_v0  ;;  %v1017_v49 = vpack.c.bf16 %v1013_v48, %v1012_v47  ;;  %v1155_v50 = vld [vmem:[#allocation17 + $0x4] sm:$0xf]  ;;  %v1142_v52 = vld [vmem:[#allocation17] sm:$0xf]  ;;  %p3336_p9 = pneg %p3335_p5 }
 0x180   : > { %980 = vst.msk [vmem:[#allocation4 + $0x8] sm:$0x1] %vm731_vm1, %v3440_v0  ;;  %982 = vst.msk [vmem:[#allocation4 + $0x18] sm:$0x1] %vm731_vm1, %v3440_v0  ;;  %v1170_v51 = vsel %vm1168_vm3, %v1155_v50, 0  ;;  %2866 = vmatprep.subr.msk.bf16.mxu0 %vm1168_vm3, %v1142_v52  ;;  %v4155_v53 = vsel %vm1168_vm3, %v1142_v52, 0 }
 0x181   : > { %983 = vst.msk [vmem:[#allocation4 + $0x20] sm:$0xff] %vm729_vm0, %v3440_v0  ;;  %985 = vst.msk [vmem:[#allocation4 + $0x30] sm:$0xff] %vm729_vm0, %v3440_v0  ;;  %2692 = vmatpush3.bf16.msra.mxu0 %v4155_v53  ;;  %v4159_v54 = vld [vmem:[#allocation17 + $0x8] sm:$0xf]  ;;  %v4163_v55 = vld [vmem:[#allocation15] ss:$0 sm:$0xff] }
 0x182   : > { %984 = vst.msk [vmem:[#allocation4 + $0x28] sm:$0x1] %vm731_vm1, %v3440_v0  ;;  %986 = vst.msk [vmem:[#allocation4 + $0x38] sm:$0x1] %vm731_vm1, %v3440_v0  ;;  %2868 = vmatprep.subr.msk.bf16.mxu0 %vm1168_vm3, %v4159_v54  ;;  %s3339_s13 = scalar_lea.vmem %s3338_s26, 2048 }
 0x183   : > { %987 = vst.msk [vmem:[#allocation4 + $0x40] sm:$0xff] %vm729_vm0, %v3440_v0  ;;  %989 = vst.msk [vmem:[#allocation4 + $0x50] sm:$0xff] %vm729_vm0, %v3440_v0  ;;  %2654 = vmatmul.mubr.msk.bf16.vlgmr.msra.gmra.mrb[8].mxu1 %vm643_vm2, %v767_v21  ;;  %p3341_p0 = scmp.lt.s32.totalorder %s3339_s13, %s3333_s16 }
 0x184   : > { %988 = vst.msk [vmem:[#allocation4 + $0x48] sm:$0x1] %vm731_vm1, %v3440_v0  ;;  %990 = vst.msk [vmem:[#allocation4 + $0x58] sm:$0x1] %vm731_vm1, %v3440_v0  ;;  %2662 = vmatpush3.bf16.msra.mxu1 %v3015_v1  ;;  %2657 = vmatprep.mubr.msk.bf16.mxu1 %vm643_vm2, %v768_v22 }
 0x185   : > { %991 = vst.msk [vmem:[#allocation4 + $0x60] sm:$0xff] %vm729_vm0, %v3440_v0  ;;  %993 = vst.msk [vmem:[#allocation4 + $0x70] sm:$0xff] %vm729_vm0, %v3440_v0  ;;  %2671 = vmatprep.subr.bf16.mxu1 %v3015_v1  ;;  %p3342_p13 = por %p3341_p0, %p3340_p7 }
 0x186   : > { %992 = vst.msk [vmem:[#allocation4 + $0x68] sm:$0x1] %vm731_vm1, %v3440_v0  ;;  %994 = vst.msk [vmem:[#allocation4 + $0x78] sm:$0x1] %vm731_vm1, %v3440_v0 }
 0x187   : > { %995 = vst.msk [vmem:[#allocation4 + $0x80] sm:$0xff] %vm729_vm0, %v3440_v0  ;;  %1103 = vst.msk [vmem:[#allocation5] sm:$0xff] %vm729_vm0, %v3440_v0  ;;  %p3343_p8 = pnand %p3342_p13, %p3336_p9 }
 0x188   : > { %996 = vst.msk [vmem:[#allocation4 + $0x88] sm:$0x1] %vm731_vm1, %v3440_v0  ;;  %1104 = vst.msk [vmem:[#allocation5 + $0x8] sm:$0x1] %vm731_vm1, %v3440_v0 }
 0x189   : > { %1105 = vst.msk [vmem:[#allocation5 + $0x10] sm:$0xff] %vm729_vm0, %v3440_v0  ;;  %1107 = vst.msk [vmem:[#allocation5 + $0x20] sm:$0xff] %vm729_vm0, %v3440_v0 }
 0x18a   : > { %1106 = vst.msk [vmem:[#allocation5 + $0x18] sm:$0x1] %vm731_vm1, %v3440_v0  ;;  %1108 = vst.msk [vmem:[#allocation5 + $0x28] sm:$0x1] %vm731_vm1, %v3440_v0 }
 0x18b   : > { %1109 = vst.msk [vmem:[#allocation5 + $0x30] sm:$0xff] %vm729_vm0, %v3440_v0  ;;  %1111 = vst.msk [vmem:[#allocation5 + $0x40] sm:$0xff] %vm729_vm0, %v3440_v0  ;;  %2658 = vmatmul.mubr.msk.bf16.gmra.mrb[12].mxu1 %vm643_vm2, %v769_v27 }
 0x18c   : > { %1110 = vst.msk [vmem:[#allocation5 + $0x38] sm:$0x1] %vm731_vm1, %v3440_v0  ;;  %1112 = vst.msk [vmem:[#allocation5 + $0x48] sm:$0x1] %vm731_vm1, %v3440_v0  ;;  %2663 = vmatprep.mubr.msk.bf16.mxu1 %vm643_vm2, %v890_v28 }
 0x18d   : > { %1113 = vst.msk [vmem:[#allocation5 + $0x50] sm:$0xff] %vm729_vm0, %v3440_v0  ;;  %1115 = vst.msk [vmem:[#allocation5 + $0x60] sm:$0xff] %vm729_vm0, %v3440_v0 }
 0x18e   : > { %1114 = vst.msk [vmem:[#allocation5 + $0x58] sm:$0x1] %vm731_vm1, %v3440_v0  ;;  %1116 = vst.msk [vmem:[#allocation5 + $0x68] sm:$0x1] %vm731_vm1, %v3440_v0 }
 0x18f   : > { %1117 = vst.msk [vmem:[#allocation5 + $0x70] sm:$0xff] %vm729_vm0, %v3440_v0  ;;  %1119 = vst.msk [vmem:[#allocation5 + $0x80] sm:$0xff] %vm729_vm0, %v3440_v0 }
 0x190   : > { %1118 = vst.msk [vmem:[#allocation5 + $0x78] sm:$0x1] %vm731_vm1, %v3440_v0  ;;  %1120 = vst.msk [vmem:[#allocation5 + $0x88] sm:$0x1] %vm731_vm1, %v3440_v0 }
 0x193   : > { %2664 = vmatmul.mubr.msk.bf16.vlgmr.msra.gmra.mrb[16].mxu1 %vm643_vm2, %v891_v33 }
 0x194   : > { %2672 = vmatpush3.bf16.msra.mxu1 %v3015_v1  ;;  %2667 = vmatprep.mubr.msk.bf16.mxu1 %vm643_vm2, %v892_v34 }
 0x195   : > { %2865 = vmatprep.subr.msk.bf16.mxu1 %vm1168_vm3, %v1155_v50 }
 0x19b   : > { %2668 = vmatmul.mubr.msk.bf16.gmra.mrb[20].mxu1 %vm643_vm2, %v893_v39 }
 0x19c   : > { %2673 = vmatprep.mubr.msk.bf16.mxu1 %vm643_vm2, %v1014_v40 }
 0x1a3   : > { %2674 = vmatmul.mubr.msk.bf16.vlgmr.msra.gmra.mrb[24].mxu1 %vm643_vm2, %v1015_v45 }
 0x1a4   : > { %2677 = vmatprep.mubr.msk.bf16.mxu1 %vm643_vm2, %v1016_v46  ;;  %2682 = vmatpush3.bf16.msra.mxu1 %v1170_v51 }
 0x1a5   : > { %2867 = vmatprep.subr.msk.bf16.mxu1 %vm1168_vm3, %v1142_v52 }
 0x1ab   : > { %2678 = vmatmul.mubr.msk.bf16.gmra.mrb[28].mxu1 %vm643_vm2, %v1017_v49 }
 0x246   : > { %v2645_v56 = vpop.f32.mrb[0].mxu1 }
 0x247   : > { %v699_v57 = vadd.f32 %v2645_v56, %v4163_v55  ;;  %v690_v58 = vpop.f32.mrb[1].mxu1 }
 0x248   : > { %v691_v59 = vadd.f32 %v4163_v55, %v690_v58  ;;  %v2646_v60 = vpop.f32.mrb[2].mxu1 }
 0x249   : > { %v723_v61 = vmax.f32 %v699_v57, 0.0  ;;  %v702_v62 = vadd.f32 %v2646_v60, %v4163_v55  ;;  %v693_v63 = vpop.f32.mrb[3].mxu1 }
 0x24a   : > { %v721_v0 = vmax.f32 %v691_v59, 0.0  ;;  %v694_v1 = vadd.f32 %v4163_v55, %v693_v63 }
 0x24b   : > { %752 = vst.msk [vmem:[#allocation2 + $0x31] sm:$0xff] %vm729_vm0, %v723_v61  ;;  %v724_v2 = vmax.f32 %v702_v62, 0.0 }
 0x24c   : > { %750 = vst.msk [vmem:[#allocation2 + $0x11] sm:$0xff] %vm729_vm0, %v721_v0  ;;  %v722_v3 = vmax.f32 %v694_v1, 0.0 }
 0x24d   : > { %753 = vst.msk [vmem:[#allocation2 + $0x41] sm:$0xff] %vm729_vm0, %v724_v2 }
 0x24e   : > { %751 = vst.msk [vmem:[#allocation2 + $0x21] sm:$0xff] %vm729_vm0, %v722_v3  ;;  %v2649_v4 = vpop.f32.mrb[4].mxu1  ;;  %v1143_v3 = vld [vmem:[#allocation4 + $0x1] sm:$0xff] }
 0x24f   : > { %v715_v6 = vadd.f32 %v2649_v4, %v4163_v55  ;;  %v706_v7 = vpop.f32.mrb[5].mxu1 }
 0x250   : > { %v707_v8 = vadd.f32 %v4163_v55, %v706_v7  ;;  %v2650_v11 = vpop.f32.mrb[6].mxu1 }
 0x251   : > { %v727_v12 = vmax.f32 %v715_v6, 0.0  ;;  %v718_v13 = vadd.f32 %v2650_v11, %v4163_v55  ;;  %v709_v14 = vpop.f32.mrb[7].mxu1 }
 0x252   : > { %v725_v16 = vmax.f32 %v707_v8, 0.0  ;;  %v710_v17 = vadd.f32 %v4163_v55, %v709_v14 }
 0x253   : > { %756 = vst.msk [vmem:[#allocation2 + $0x71] sm:$0xff] %vm729_vm0, %v727_v12  ;;  %v728_v18 = vmax.f32 %v718_v13, 0.0 }
 0x254   : > { %754 = vst.msk [vmem:[#allocation2 + $0x51] sm:$0xff] %vm729_vm0, %v725_v16  ;;  %v726_v19 = vmax.f32 %v710_v17, 0.0 }
 0x255   : > { %757 = vst.msk [vmem:[#allocation2 + $0x81] sm:$0xff] %vm729_vm0, %v728_v18 }
 0x256   : > { %755 = vst.msk [vmem:[#allocation2 + $0x61] sm:$0xff] %vm729_vm0, %v726_v19  ;;  %v2655_v20 = vpop.f32.mrb[8].mxu1 }
 0x257   : > { %v825_v21 = vadd.f32 %v2655_v20, %v4163_v55  ;;  %v816_v22 = vpop.f32.mrb[9].mxu1 }
 0x258   : > { %v817_v23 = vadd.f32 %v4163_v55, %v816_v22  ;;  %v2656_v24 = vpop.f32.mrb[10].mxu1 }
 0x259   : > { %v849_v25 = vmax.f32 %v825_v21, 0.0  ;;  %v828_v26 = vadd.f32 %v2656_v24, %v4163_v55  ;;  %v819_v27 = vpop.f32.mrb[11].mxu1 }
 0x25a   : > { %v847_v28 = vmax.f32 %v817_v23, 0.0  ;;  %v820_v29 = vadd.f32 %v4163_v55, %v819_v27 }
 0x25b   : > { %876 = vst.msk [vmem:[#allocation3 + $0x31] sm:$0xff] %vm729_vm0, %v849_v25  ;;  %v850_v30 = vmax.f32 %v828_v26, 0.0 }
 0x25c   : > { %874 = vst.msk [vmem:[#allocation3 + $0x11] sm:$0xff] %vm729_vm0, %v847_v28  ;;  %v848_v31 = vmax.f32 %v820_v29, 0.0 }
 0x25d   : > { %877 = vst.msk [vmem:[#allocation3 + $0x41] sm:$0xff] %vm729_vm0, %v850_v30 }
 0x25e   : > { %875 = vst.msk [vmem:[#allocation3 + $0x21] sm:$0xff] %vm729_vm0, %v848_v31  ;;  %v2659_v32 = vpop.f32.mrb[12].mxu1 }
 0x25f   : > { %v841_v33 = vadd.f32 %v2659_v32, %v4163_v55  ;;  %v832_v34 = vpop.f32.mrb[13].mxu1 }
 0x260   : > { %v833_v35 = vadd.f32 %v4163_v55, %v832_v34  ;;  %v2660_v36 = vpop.f32.mrb[14].mxu1 }
 0x261   : > { %v853_v37 = vmax.f32 %v841_v33, 0.0  ;;  %v844_v38 = vadd.f32 %v2660_v36, %v4163_v55  ;;  %v835_v39 = vpop.f32.mrb[15].mxu1 }
 0x262   : > { %v851_v40 = vmax.f32 %v833_v35, 0.0  ;;  %v836_v41 = vadd.f32 %v4163_v55, %v835_v39 }
 0x263   : > { %880 = vst.msk [vmem:[#allocation3 + $0x71] sm:$0xff] %vm729_vm0, %v853_v37  ;;  %v854_v42 = vmax.f32 %v844_v38, 0.0 }
 0x264   : > { %878 = vst.msk [vmem:[#allocation3 + $0x51] sm:$0xff] %vm729_vm0, %v851_v40  ;;  %v852_v43 = vmax.f32 %v836_v41, 0.0 }
 0x265   : > { %881 = vst.msk [vmem:[#allocation3 + $0x81] sm:$0xff] %vm729_vm0, %v854_v42 }
 0x266   : > { %879 = vst.msk [vmem:[#allocation3 + $0x61] sm:$0xff] %vm729_vm0, %v852_v43  ;;  %v2665_v44 = vpop.f32.mrb[16].mxu1 }
 0x267   : > { %v949_v45 = vadd.f32 %v2665_v44, %v4163_v55  ;;  %v940_v46 = vpop.f32.mrb[17].mxu1 }
 0x268   : > { %v941_v47 = vadd.f32 %v4163_v55, %v940_v46  ;;  %v2666_v48 = vpop.f32.mrb[18].mxu1 }
 0x269   : > { %v973_v49 = vmax.f32 %v949_v45, 0.0  ;;  %v952_v50 = vadd.f32 %v2666_v48, %v4163_v55  ;;  %v943_v51 = vpop.f32.mrb[19].mxu1  ;;  %v1130_v45 = vld [vmem:[#allocation5] sm:$0xff] }
 0x26a   : > { %v971_v52 = vmax.f32 %v941_v47, 0.0  ;;  %v944_v56 = vadd.f32 %v4163_v55, %v943_v51  ;;  %v1317_v48 = vld [vmem:[#allocation5 + $0x1] sm:$0xff] }
 0x26b   : > { %1000 = vst.msk [vmem:[#allocation4 + $0x31] sm:$0xff] %vm729_vm0, %v973_v49  ;;  %v974_v57 = vmax.f32 %v952_v50, 0.0 }
 0x26c   : > { %998 = vst.msk [vmem:[#allocation4 + $0x11] sm:$0xff] %vm729_vm0, %v971_v52  ;;  %v972_v58 = vmax.f32 %v944_v56, 0.0 }
 0x26d   : > { %1001 = vst.msk [vmem:[#allocation4 + $0x41] sm:$0xff] %vm729_vm0, %v974_v57 }
 0x26e   : > { %999 = vst.msk [vmem:[#allocation4 + $0x21] sm:$0xff] %vm729_vm0, %v972_v58  ;;  %v2669_v59 = vpop.f32.mrb[20].mxu1 }
 0x26f   : > { %v965_v60 = vadd.f32 %v2669_v59, %v4163_v55  ;;  %v956_v61 = vpop.f32.mrb[21].mxu1 }
 0x270   : > { %v957_v62 = vadd.f32 %v4163_v55, %v956_v61  ;;  %v2670_v63 = vpop.f32.mrb[22].mxu1 }
 0x271   : > { %v977_v0 = vmax.f32 %v965_v60, 0.0  ;;  %v968_v1 = vadd.f32 %v2670_v63, %v4163_v55  ;;  %v959_v2 = vpop.f32.mrb[23].mxu1 }
 0x272   : > { %v975_v4 = vmax.f32 %v957_v62, 0.0  ;;  %v960_v6 = vadd.f32 %v4163_v55, %v959_v2  ;;  %v4214_v13 = vld [vmem:[#allocation4 + $0x31] sm:$0xff] }
 0x273   : > { %1004 = vst.msk [vmem:[#allocation4 + $0x71] sm:$0xff] %vm729_vm0, %v977_v0  ;;  %v978_v7 = vmax.f32 %v968_v1, 0.0  ;;  %v4210_v8 = vld [vmem:[#allocation4 + $0x11] sm:$0xff]  ;;  %v1343_v1 = vsel %vm1168_vm3, %v4159_v54, 0 }
 0x274   : > { %1002 = vst.msk [vmem:[#allocation4 + $0x51] sm:$0xff] %vm729_vm0, %v975_v4  ;;  %v976_v11 = vmax.f32 %v960_v6, 0.0  ;;  %v1151_v12 = vpack.c.bf16 %v4210_v8, %v1143_v3  ;;  %v4216_v14 = vld [vmem:[#allocation4 + $0x41] sm:$0xff]  ;;  %v1430_v6 = vld [vmem:[#allocation17 + $0xc] sm:$0xf] }
 0x275   : > { %1005 = vst.msk [vmem:[#allocation4 + $0x81] sm:$0xff] %vm729_vm0, %v978_v7  ;;  %v4219_v16 = vld [vmem:[#allocation4 + $0x21] sm:$0xff]  ;;  %v1831_v17 = vpack.c.bf16 %v4216_v14, %v4214_v13 }
 0x276   : > { %1003 = vst.msk [vmem:[#allocation4 + $0x61] sm:$0xff] %vm729_vm0, %v976_v11  ;;  %v2675_v18 = vpop.f32.mrb[24].mxu1  ;;  %2683 = vmatprep.mubr.msk.bf16.mxu1 %vm729_vm0, %v1151_v12  ;;  %v1152_v19 = vpack.c.bf16 %v4214_v13, %v4219_v16  ;;  %v1830_v20 = vpack.c.bf16 %v4219_v16, %v4210_v8 }
 0x277   : > { %v1073_v21 = vadd.f32 %v2675_v18, %v4163_v55  ;;  %v1064_v22 = vpop.f32.mrb[25].mxu1 }
 0x278   : > { %v1065_v23 = vadd.f32 %v4163_v55, %v1064_v22  ;;  %v2676_v24 = vpop.f32.mrb[26].mxu1  ;;  %2684 = vmatmul.mubr.msk.bf16.vlgmr.msra.gmra.mrb[32].mxu1 %vm729_vm0, %v1152_v19 }
 0x279   : > { %v1097_v25 = vmax.f32 %v1073_v21, 0.0  ;;  %v1076_v26 = vadd.f32 %v2676_v24, %v4163_v55  ;;  %v1067_v27 = vpop.f32.mrb[27].mxu1  ;;  %2792 = vmatpush3.bf16.msra.mxu1 %v4155_v53 }
 0x27a   : > { %v1095_v28 = vmax.f32 %v1065_v23, 0.0  ;;  %v1068_v29 = vadd.f32 %v4163_v55, %v1067_v27  ;;  %v4244_v35 = vld [vmem:[#allocation4 + $0x71] sm:$0xff]  ;;  %v1531_v27 = vld [vmem:[#allocation17 + $0x10] sm:$0xf] }
 0x27b   : > { %1124 = vst.msk [vmem:[#allocation5 + $0x31] sm:$0xff] %vm729_vm0, %v1097_v25  ;;  %v1098_v30 = vmax.f32 %v1076_v26, 0.0  ;;  %v4236_v31 = vld [vmem:[#allocation4 + $0x51] sm:$0xff]  ;;  %v1444_v25 = vsel %vm1168_vm3, %v1430_v6, 0 }
 0x27c   : > { %1122 = vst.msk [vmem:[#allocation5 + $0x11] sm:$0xff] %vm729_vm0, %v1095_v28  ;;  %v1096_v32 = vmax.f32 %v1068_v29, 0.0  ;;  %v1153_v33 = vpack.c.bf16 %v4236_v31, %v4216_v14  ;;  %v1419_v29 = vld [vmem:[#allocation3 + $0x20] sm:$0xff] }
 0x27d   : > { %1125 = vst.msk [vmem:[#allocation5 + $0x41] sm:$0xff] %vm729_vm0, %v1098_v30  ;;  %v4242_v34 = vld [vmem:[#allocation4 + $0x61] sm:$0xff] }
 0x27e   : > { %1123 = vst.msk [vmem:[#allocation5 + $0x21] sm:$0xff] %vm729_vm0, %v1096_v32  ;;  %v2679_v53 = vpop.f32.mrb[28].mxu1  ;;  %2687 = vmatprep.mubr.msk.bf16.mxu1 %vm729_vm0, %v1153_v33  ;;  %v1154_v36 = vpack.c.bf16 %v4244_v35, %v4242_v34  ;;  %v1832_v37 = vpack.c.bf16 %v4242_v34, %v4236_v31  ;;  %v1418_v30 = vld [vmem:[#allocation3 + $0x10] sm:$0xff]  ;;  %v1421_v33 = vld [vmem:[#allocation3 + $0x40] sm:$0xff] }
 0x27f   : > { %v1089_v38 = vadd.f32 %v2679_v53, %v4163_v55  ;;  %v1080_v39 = vpop.f32.mrb[29].mxu1  ;;  %v1426_v32 = vpack.c.bf16 %v1419_v29, %v1418_v30  ;;  %v1423_v53 = vld [vmem:[#allocation3 + $0x60] sm:$0xff] }
 0x280   : > { %v1081_v40 = vadd.f32 %v4163_v55, %v1080_v39  ;;  %v2680_v41 = vpop.f32.mrb[30].mxu1  ;;  %2688 = vmatmul.mubr.msk.bf16.gmra.mrb[36].mxu1 %vm729_vm0, %v1154_v36  ;;  %v1420_v36 = vld [vmem:[#allocation3 + $0x30] sm:$0xff]  ;;  %v1625_v30 = vld [vmem:[#allocation3 + $0x61] sm:$0xff] }
 0x281   : > { %v1101_v42 = vmax.f32 %v1089_v38, 0.0  ;;  %v1092_v43 = vadd.f32 %v2680_v41, %v4163_v55  ;;  %v1083_v44 = vpop.f32.mrb[31].mxu1  ;;  %v1427_v38 = vpack.c.bf16 %v1421_v33, %v1420_v36  ;;  %v1422_v39 = vld [vmem:[#allocation3 + $0x50] sm:$0xff] }
 0x282   : > { %v1099_v46 = vmax.f32 %v1081_v40, 0.0  ;;  %v1084_v47 = vadd.f32 %v4163_v55, %v1083_v44  ;;  %v4260_v51 = vld [vmem:[#allocation5 + $0x30] sm:$0xff]  ;;  %v1545_v40 = vsel %vm1168_vm3, %v1531_v27, 0  ;;  %v1428_v41 = vpack.c.bf16 %v1423_v53, %v1422_v39 }
 0x283   : > { %1128 = vst.msk [vmem:[#allocation5 + $0x71] sm:$0xff] %vm729_vm0, %v1101_v42  ;;  %v1102_v49 = vmax.f32 %v1092_v43, 0.0  ;;  %v4258_v50 = vld [vmem:[#allocation5 + $0x10] sm:$0xff]  ;;  %v1425_v43 = vld [vmem:[#allocation3 + $0x80] sm:$0xff] }
 0x284   : > { %v4262_v52 = vld [vmem:[#allocation5 + $0x31] sm:$0xff]  ;;  %1126 = vst.msk [vmem:[#allocation5 + $0x51] sm:$0xff] %vm729_vm0, %v1099_v46  ;;  %v1100_v56 = vmax.f32 %v1084_v47, 0.0  ;;  %v1138_v57 = vpack.c.bf16 %v4258_v50, %v1130_v45  ;;  %v4268_v59 = vld [vmem:[#allocation5 + $0x40] sm:$0xff] }
 0x285   : > { %v4266_v58 = vld [vmem:[#allocation5 + $0x11] sm:$0xff]  ;;  %v4270_v55 = vld [vmem:[#allocation5 + $0x41] sm:$0xff]  ;;  %1129 = vst.msk [vmem:[#allocation5 + $0x81] sm:$0xff] %vm729_vm0, %v1102_v49  ;;  %v1730_v62 = vpack.c.bf16 %v4268_v59, %v4260_v51 }
 0x286   : > { %v4273_v60 = vld [vmem:[#allocation5 + $0x20] sm:$0xff]  ;;  %v1932_v63 = vpack.c.bf16 %v4270_v55, %v4262_v52  ;;  %1127 = vst.msk [vmem:[#allocation5 + $0x61] sm:$0xff] %vm729_vm0, %v1100_v56  ;;  %2693 = vmatprep.mubr.msk.bf16.mxu0 %vm729_vm0, %v1138_v57  ;;  %v1325_v4 = vpack.c.bf16 %v4266_v58, %v1317_v48  ;;  %v1632_v42 = vld [vmem:[#allocation17 + $0x14] sm:$0xf]  ;;  %v1834_v39 = vld [vmem:[#allocation17 + $0x1c] sm:$0xf] }
 0x287   : > { %v4275_v61 = vld [vmem:[#allocation5 + $0x21] sm:$0xff]  ;;  %v1139_v0 = vpack.c.bf16 %v4260_v51, %v4273_v60  ;;  %v1729_v2 = vpack.c.bf16 %v4273_v60, %v4258_v50  ;;  %v1520_v44 = vld [vmem:[#allocation2 + $0x21] sm:$0xff] }
 0x288   : > { %v1931_v3 = vpack.c.bf16 %v4275_v61, %v4266_v58  ;;  %v1326_v24 = vpack.c.bf16 %v4262_v52, %v4275_v61  ;;  %v1424_v45 = vld [vmem:[#allocation3 + $0x70] sm:$0xff]  ;;  %v1519_v47 = vld [vmem:[#allocation2 + $0x11] sm:$0xff] }
 0x289   : > { %2694 = vmatmul.mubr.msk.bf16.vlgmr.msra.gmra.mrb[0].mxu0 %vm729_vm0, %v1139_v0  ;;  %v1429_v46 = vpack.c.bf16 %v1425_v43, %v1424_v45  ;;  %v1527_v48 = vpack.c.bf16 %v1520_v44, %v1519_v47  ;;  %v1522_v49 = vld [vmem:[#allocation2 + $0x41] sm:$0xff]  ;;  %v1521_v57 = vld [vmem:[#allocation2 + $0x31] sm:$0xff]  ;;  %v1848_v43 = vsel %vm1168_vm3, %v1834_v39, 0  ;;  %v1935_v44 = vld [vmem:[#allocation17 + $0x20] sm:$0xf] }
 0x28a   : > { %2702 = vmatpush3.bf16.msra.mxu0 %v1343_v1  ;;  %2703 = vmatprep.mubr.msk.bf16.mxu0 %vm729_vm0, %v1325_v4  ;;  %v4297_v11 = vld [vmem:[#allocation5 + $0x70] sm:$0xff]  ;;  %v1528_v0 = vpack.c.bf16 %v1522_v49, %v1521_v57  ;;  %v1523_v1 = vld [vmem:[#allocation2 + $0x51] sm:$0xff]  ;;  %v1646_v4 = vsel %vm1168_vm3, %v1632_v42, 0  ;;  %v1949_v51 = vsel %vm1168_vm3, %v1935_v44, 0 }
 0x28b   : > { %2869 = vmatprep.subr.msk.bf16.mxu0 %vm1168_vm3, %v1430_v6  ;;  %v4295_v7 = vld [vmem:[#allocation5 + $0x50] sm:$0xff] }
 0x28c   : > { %v1140_v54 = vpack.c.bf16 %v4295_v7, %v4268_v59  ;;  %v4303_v18 = vld [vmem:[#allocation5 + $0x51] sm:$0xff]  ;;  %v1728_v45 = vld [vmem:[#allocation5 + $0x80] sm:$0xff] }
 0x28d   : > { %v4301_v12 = vld [vmem:[#allocation5 + $0x60] sm:$0xff]  ;;  %v1327_v26 = vpack.c.bf16 %v4303_v18, %v4270_v55  ;;  %v4325_v28 = vld [vmem:[#allocation5 + $0x71] sm:$0xff]  ;;  %v1732_v50 = vpack.c.bf16 %v1728_v45, %v4297_v11 }
 0x28e   : > { %v4305_v19 = vld [vmem:[#allocation5 + $0x61] sm:$0xff]  ;;  %2697 = vmatprep.mubr.msk.bf16.mxu1 %vm729_vm0, %v1140_v54  ;;  %v1141_v21 = vpack.c.bf16 %v4297_v11, %v4301_v12  ;;  %v1731_v22 = vpack.c.bf16 %v4301_v12, %v4295_v7  ;;  %v1524_v56 = vld [vmem:[#allocation2 + $0x61] sm:$0xff] }
 0x28f   : > { %v1933_v23 = vpack.c.bf16 %v4305_v19, %v4303_v18  ;;  %v1529_v6 = vpack.c.bf16 %v1524_v56, %v1523_v1  ;;  %v1733_v54 = vld [vmem:[#allocation17 + $0x18] sm:$0xf]  ;;  %v3016_v59 = vld [vmem:[#allocation23] sm:$0xff]  }
 0x290   : > { %2698 = vmatmul.mubr.msk.bf16.vlgmr.msra.gmra.mrb[36].mxu1 %vm729_vm0, %v1141_v21  ;;  %v1526_v21 = vld [vmem:[#allocation2 + $0x81] sm:$0xff]  ;;  %v1747_v36 = vsel %vm1168_vm3, %v1733_v54, 0  ;;  %2771 = vmatprep.subr.bf16.mxu1 %v3016_v59 }
 0x291   : > { %2773 = vmatprep.mubr.msk.bf16.mxu1 %vm643_vm2, %v4094_v5  ;;  %v1328_v5 = vpack.c.bf16 %v4325_v28, %v4305_v19  ;;  %v1624_v53 = vld [vmem:[#allocation3 + $0x51] sm:$0xff]  ;;  %2772 = vmatpush3.bf16.msra.mxu1 %v3016_v59 }
 0x292   : > { %v1829_v60 = vld [vmem:[#allocation4 + $0x81] sm:$0xff] }
 0x293   : > { %v1833_v8 = vpack.c.bf16 %v1829_v60, %v4244_v35 }
 0x295   : > { %2704 = vmatmul.mubr.msk.bf16.vlgmr.msra.gmra.mrb[0].mxu0 %vm729_vm0, %v1326_v24  ;;  %v1621_v24 = vld [vmem:[#allocation3 + $0x21] sm:$0xff] }
 0x296   : > { %2707 = vmatprep.mubr.msk.bf16.mxu0 %vm729_vm0, %v1327_v26  ;;  %2712 = vmatpush3.bf16.msra.mxu0 %v1444_v25  ;;  %v1525_v25 = vld [vmem:[#allocation2 + $0x71] sm:$0xff] }
 0x297   : > { %2870 = vmatprep.subr.msk.bf16.mxu0 %vm1168_vm3, %v1531_v27  ;;  %v1530_v26 = vpack.c.bf16 %v1526_v21, %v1525_v25  ;;  %v1620_v27 = vld [vmem:[#allocation3 + $0x11] sm:$0xff] }
 0x298   : > { %v1628_v29 = vpack.c.bf16 %v1621_v24, %v1620_v27  ;;  %2774 = vmatmul.mubr.msk.bf16.vlgmr.msra.gmra.mrb[40].mxu1 %vm643_vm2, %v4099_v9  ;;  %v1930_v9 = vld [vmem:[#allocation5 + $0x81] sm:$0xff] }
 0x299   : > { %2777 = vmatprep.mubr.msk.bf16.mxu1 %vm643_vm2, %v4101_v10  ;;  %v1934_v13 = vpack.c.bf16 %v1930_v9, %v4325_v28 }
 0x29d   : > { %2708 = vmatmul.mubr.msk.bf16.gmra.mrb[4].mxu0 %vm729_vm0, %v1328_v5  ;;  %v1623_v5 = vld [vmem:[#allocation3 + $0x41] sm:$0xff] }
 0x29e   : > { %2713 = vmatprep.mubr.msk.bf16.mxu0 %vm729_vm0, %v1426_v32  ;;  %v1622_v32 = vld [vmem:[#allocation3 + $0x31] sm:$0xff] }
 0x29f   : > { %v1629_v33 = vpack.c.bf16 %v1623_v5, %v1622_v32 }
 0x2a0   : > { %2778 = vmatmul.mubr.msk.bf16.gmra.mrb[44].mxu1 %vm643_vm2, %v4113_v15  ;;  %v2545_v15 = vld [vmem:[#allocation18] ss:$0 sm:$0xff] }
 0x2a5   : > { %2714 = vmatmul.mubr.msk.bf16.vlgmr.msra.gmra.mrb[0].mxu0 %vm729_vm0, %v1427_v38  ;;  %v1630_v38 = vpack.c.bf16 %v1625_v30, %v1624_v53  ;;  %v2555_v53 = vld [vmem:[#allocation21] ss:$0 sm:$0xff] }
 0x2a6   : > { %2717 = vmatprep.mubr.msk.bf16.mxu0 %vm729_vm0, %v1428_v41  ;;  %2722 = vmatpush3.bf16.msra.mxu0 %v1545_v40  ;;  %v1627_v40 = vld [vmem:[#allocation3 + $0x81] sm:$0xff]  ;;  %v1626_v41 = vld [vmem:[#allocation3 + $0x71] sm:$0xff] }
 0x2a7   : > { %2871 = vmatprep.subr.msk.bf16.mxu0 %vm1168_vm3, %v1632_v42  ;;  %v1631_v42 = vpack.c.bf16 %v1627_v40, %v1626_v41 }
 0x2ad   : > { %2718 = vmatmul.mubr.msk.bf16.gmra.mrb[4].mxu0 %vm729_vm0, %v1429_v46 }
 0x2ae   : > { %2723 = vmatprep.mubr.msk.bf16.mxu0 %vm729_vm0, %v1527_v48 }
 0x2b5   : > { %2724 = vmatmul.mubr.msk.bf16.vlgmr.msra.gmra.mrb[0].mxu0 %vm729_vm0, %v1528_v0 }
 0x2b6   : > { %2727 = vmatprep.mubr.msk.bf16.mxu0 %vm729_vm0, %v1529_v6  ;;  %2732 = vmatpush3.bf16.msra.mxu0 %v1646_v4 }
 0x2b7   : > { %2872 = vmatprep.subr.msk.bf16.mxu0 %vm1168_vm3, %v1733_v54 }
 0x2bd   : > { %2728 = vmatmul.mubr.msk.bf16.gmra.mrb[4].mxu0 %vm729_vm0, %v1530_v26 }
 0x2be   : > { %2733 = vmatprep.mubr.msk.bf16.mxu0 %vm729_vm0, %v1628_v29 }
 0x2c5   : > { %2734 = vmatmul.mubr.msk.bf16.vlgmr.msra.gmra.mrb[0].mxu0 %vm729_vm0, %v1629_v33 }
 0x2c6   : > { %2737 = vmatprep.mubr.msk.bf16.mxu0 %vm729_vm0, %v1630_v38  ;;  %2742 = vmatpush3.bf16.msra.mxu0 %v1747_v36 }
 0x2c7   : > { %2873 = vmatprep.subr.msk.bf16.mxu0 %vm1168_vm3, %v1834_v39 }
 0x2cd   : > { %2738 = vmatmul.mubr.msk.bf16.gmra.mrb[4].mxu0 %vm729_vm0, %v1631_v42 }
 0x2ce   : > { %2743 = vmatprep.mubr.msk.bf16.mxu0 %vm729_vm0, %v1729_v2 }
 0x2d5   : > { %2744 = vmatmul.mubr.msk.bf16.vlgmr.msra.gmra.mrb[0].mxu0 %vm729_vm0, %v1730_v62  ;;  %v2051_v62 = vld [vmem:[#allocation20] sm:$0xf] }
 0x2d6   : > { %2747 = vmatprep.mubr.msk.bf16.mxu0 %vm729_vm0, %v1731_v22  ;;  %2752 = vmatpush3.bf16.msra.mxu0 %v1848_v43  ;;  %v2138_v16 = vsel %vm1168_vm3, %v2051_v62, 0 }
 0x2d7   : > { %2874 = vmatprep.subr.msk.bf16.mxu0 %vm1168_vm3, %v1935_v44  ;;  %2875 = vmatprep.subr.msk.bf16.mxu1 %vm1168_vm3, %v2051_v62 }
 0x2d8   : > { %2782 = vmatpush3.bf16.msra.mxu1 %v2138_v16 }
 0x2dd   : > { %2748 = vmatmul.mubr.msk.bf16.gmra.mrb[4].mxu0 %vm729_vm0, %v1732_v50 }
 0x2de   : > { %2753 = vmatprep.mubr.msk.bf16.mxu0 %vm729_vm0, %v1830_v20 }
 0x2e5   : > { %2754 = vmatmul.mubr.msk.bf16.vlgmr.msra.gmra.mrb[0].mxu0 %vm729_vm0, %v1831_v17 }
 0x2e6   : > { %2757 = vmatprep.mubr.msk.bf16.mxu0 %vm729_vm0, %v1832_v37  ;;  %2762 = vmatpush3.bf16.msra.mxu0 %v1949_v51 }
 0x2ed   : > { %2758 = vmatmul.mubr.msk.bf16.gmra.mrb[4].mxu0 %vm729_vm0, %v1833_v8 }
 0x2ee   : > { %2763 = vmatprep.mubr.msk.bf16.mxu0 %vm729_vm0, %v1931_v3 }
 0x2f5   : > { %2764 = vmatmul.mubr.msk.bf16.vlgmr.msra.gmra.mrb[0].mxu0 %vm729_vm0, %v1932_v63 }
 0x2f6   : > { %2767 = vmatprep.mubr.msk.bf16.mxu0 %vm729_vm0, %v1933_v23 }
 0x2fd   : > { %2768 = vmatmul.mubr.msk.bf16.gmra.mrb[4].mxu0 %vm729_vm0, %v1934_v13 }
 0x34b   : > { %v2685_v14 = vpop.f32.mrb[32].mxu1 }
 0x34c   : > { %v1206_v10 = vpop.f32.mrb[33].mxu1 }
 0x34d   : > { %v2686_v17 = vpop.f32.mrb[34].mxu1 }
 0x34e   : > { %v1209_v20 = vpop.f32.mrb[35].mxu1 }
 0x363   : > { %v2699_v31 = vpop.f32.mrb[36].mxu1 }
 0x364   : > { %v1302_v34 = vpop.f32.mrb[37].mxu1 }
 0x365   : > { %v2700_v35 = vpop.f32.mrb[38].mxu1 }
 0x366   : > { %v1305_v37 = vpop.f32.mrb[39].mxu1 }
 0x3c8   : > { %v2765_v52 = vpop.f32.mrb[0].mxu0 }
 0x3c9   : > { %v2793_v58 = vadd.f32 %v2765_v52, %v2685_v14  ;;  %v1985_v55 = vpop.f32.mrb[1].mxu0 }
 0x3ca   : > { %v2794_v61 = vadd.f32 %v1985_v55, %v1206_v10  ;;  %v2766_v63 = vpop.f32.mrb[2].mxu0 }
 0x3cb   : > { %v2033_v2 = vadd.f32 %v2793_v58, %v2545_v15  ;;  %v2795_v3 = vadd.f32 %v2766_v63, %v2686_v17  ;;  %v1988_v7 = vpop.f32.mrb[3].mxu0 }
 0x3cc   : > { %v2031_v11 = vadd.f32 %v2794_v61, %v2545_v15  ;;  %v2796_v12 = vadd.f32 %v1988_v7, %v1209_v20 }
 0x3cd   : > { %v2034_v18 = vadd.f32 %v2795_v3, %v2545_v15  ;;  %v2041_v22 = vmax.f32 %v2033_v2, 0.0 }
 0x3ce   : > { %v2032_v19 = vadd.f32 %v2796_v12, %v2545_v15  ;;  %v2039_v28 = vmax.f32 %v2031_v11, 0.0 }
 0x3cf   : > { %v2042_v23 = vmax.f32 %v2034_v18, 0.0 }
 0x3d0   : > { %v2040_v46 = vmax.f32 %v2032_v19, 0.0  ;;  %v2769_v47 = vpop.f32.mrb[4].mxu0 }
 0x3d1   : > { %v2048_v48 = vpack.c.bf16 %v2042_v23, %v2041_v22  ;;  %v2797_v49 = vadd.f32 %v2769_v47, %v2699_v31  ;;  %v2001_v56 = vpop.f32.mrb[5].mxu0 }
 0x3d2   : > { %v2047_v57 = vpack.c.bf16 %v2040_v46, %v2039_v28  ;;  %v2798_v0 = vadd.f32 %v2001_v56, %v1302_v34  ;;  %v2770_v1 = vpop.f32.mrb[6].mxu0 }
 0x3d3   : > { %v2037_v4 = vadd.f32 %v2797_v49, %v2545_v15  ;;  %v2799_v6 = vadd.f32 %v2770_v1, %v2700_v35  ;;  %v2004_v54 = vpop.f32.mrb[7].mxu0 }
 0x3d4   : > { %v2035_v21 = vadd.f32 %v2798_v0, %v2545_v15  ;;  %v2800_v24 = vadd.f32 %v2004_v54, %v1305_v37  ;;  %2783 = vmatprep.mubr.msk.bf16.mxu1 %vm729_vm0, %v2047_v57 }
 0x3d5   : > { %v2038_v25 = vadd.f32 %v2799_v6, %v2545_v15  ;;  %2784 = vmatmul.mubr.msk.bf16.vlgmr.msra.gmra.mrb[40].mxu1 %vm729_vm0, %v2048_v48  ;;  %v2045_v27 = vmax.f32 %v2037_v4, 0.0 }
 0x3d6   : > { %v2036_v26 = vadd.f32 %v2800_v24, %v2545_v15  ;;  %v2043_v5 = vmax.f32 %v2035_v21, 0.0 }
 0x3d7   : > { %v2046_v29 = vmax.f32 %v2038_v25, 0.0 }
 0x3d8   : > { %v2044_v30 = vmax.f32 %v2036_v26, 0.0 }
 0x3d9   : > { %v2050_v32 = vpack.c.bf16 %v2046_v29, %v2045_v27 }
 0x3da   : > { %v2049_v33 = vpack.c.bf16 %v2044_v30, %v2043_v5 }
 0x3dc   : > { %2787 = vmatprep.mubr.msk.bf16.mxu1 %vm729_vm0, %v2049_v33 }
 0x3dd   : > { %2788 = vmatmul.mubr.msk.bf16.gmra.mrb[44].mxu1 %vm729_vm0, %v2050_v32 }
 0x4a8   : > { %v2785_v36 = vpop.f32.mrb[40].mxu1 }
 0x4a9   : > { %v2214_v38 = vadd.f32 %v2785_v36, %v2555_v53  ;;  %v2174_v39 = vpop.f32.mrb[41].mxu1 }
 0x4aa   : > { %v2212_v40 = vadd.f32 %v2555_v53, %v2174_v39  ;;  %v2786_v41 = vpop.f32.mrb[42].mxu1 }
 0x4ab   : > { %v2222_v42 = vmax.f32 %v2214_v38, 0.0  ;;  %v2215_v43 = vadd.f32 %v2786_v41, %v2555_v53  ;;  %v2177_v44 = vpop.f32.mrb[43].mxu1 }
 0x4ac   : > { %v2220_v45 = vmax.f32 %v2212_v40, 0.0  ;;  %v2213_v50 = vadd.f32 %v2555_v53, %v2177_v44 }
 0x4ad   : > { %2231 = vst.msk [vmem:[%s614_s14 + $0x10] sm:$0xff] %vm2228_vm4, %v2222_v42  ;;  %v2223_v51 = vmax.f32 %v2215_v43, 0.0 }
 0x4ae   : > { %2229 = vst.msk [vmem:[%s614_s14] sm:$0xff] %vm2228_vm4, %v2220_v45  ;;  %v2221_v59 = vmax.f32 %v2213_v50, 0.0 }
 0x4af   : > { %2232 = vst.msk [vmem:[%s614_s14 + $0x18] sm:$0xff] %vm2228_vm4, %v2223_v51 }
 0x4b0   : > { %2230 = vst.msk [vmem:[%s614_s14 + $0x8] sm:$0xff] %vm2228_vm4, %v2221_v59  ;;  %v2789_v60 = vpop.f32.mrb[44].mxu1 }
 0x4b1   : > { %v2218_v62 = vadd.f32 %v2789_v60, %v2555_v53  ;;  %v2190_v8 = vpop.f32.mrb[45].mxu1 }
 0x4b2   : > { %v2216_v16 = vadd.f32 %v2555_v53, %v2190_v8  ;;  %v2790_v9 = vpop.f32.mrb[46].mxu1 }
 0x4b3   : > { %v2226_v13 = vmax.f32 %v2218_v62, 0.0  ;;  %v2219_v14 = vadd.f32 %v2790_v9, %v2555_v53  ;;  %v2193_v10 = vpop.f32.mrb[47].mxu1 }
 0x4b4   : > { %v2224_v17 = vmax.f32 %v2216_v16, 0.0  ;;  %v2217_v20 = vadd.f32 %v2555_v53, %v2193_v10 }
 0x4b5   : > { %2235 = vst.msk [vmem:[%s614_s14 + $0x30] sm:$0xff] %vm2228_vm4, %v2226_v13  ;;  %v2227_v31 = vmax.f32 %v2219_v14, 0.0 }
 0x4b6   : > { %2233 = vst.msk [vmem:[%s614_s14 + $0x20] sm:$0xff] %vm2228_vm4, %v2224_v17  ;;  %v2225_v34 = vmax.f32 %v2217_v20, 0.0 }
 0x4b7   : > { %2236 = vst.msk [vmem:[%s614_s14 + $0x38] sm:$0xff] %vm2228_vm4, %v2227_v31 }
 0x4b8   : > { %2234 = vst.msk [vmem:[%s614_s14 + $0x28] sm:$0xff] %vm2228_vm4, %v2225_v34 }
 0x4b9   : > { %3346 = shalt.err (!%p3343_p8)
}
 0x4ba   : > { %s3347_s30 = scalar_lea.hbm %s4415_s5, 1024  ;;  %s3351_s11 = scalar_lea.hbm %s4558_s3, 2048 }
 0x4bb   : > { %p3348_p6 = scmp.ne.s32.totalorder %s4415_s5, %s3347_s30  ;;  %p3352_p12 = scmp.lt.u32.totalorder %s4415_s5, %s4558_s3 }
 0x4bc   : > { %p3353_p4 = scmp.lt.u32.totalorder %s3351_s11, %s3347_s30  ;;  %p3355_p2 = scmp.lt.u32.totalorder %s3347_s30, %s4415_s5 }
 0x4bd   : > { %p3349_p1 = pnand %p3348_p6, %p4559_p3 }
 0x4be   : > { %p3354_p10 = por %p3353_p4, %p3352_p12 }
 0x4bf   : > { %p3350_p11 = pneg %p3349_p1 }
 0x4c0   : > { %p3356_p5 = por %p3355_p2, %p3354_p10 }
 0x4c2   : > { %p3357_p9 = pnand %p3356_p5, %p3350_p11 }
 0x4c4   : > { %3360 = shalt.err (!%p3357_p9)
}
 0x4c5   : > { %s3442_s28 = smov 128   ;;  %s3443_s23 = smov 8  }
 0x4c6   : > { %2912 = dma.vmem_to_hbm [thread:$0]  (%p4559_p3), %s4417_s9, 1024, %s4415_s5, %s2238_s25, %s3442_s28, %s3442_s28, %s3443_s23  }
 0x4c7 PF: > { %s4560_s14 = sld [smem:[#allocation33_spill]]  ;;  %s4561_s4 = sld [smem:[#allocation39_spill]] }
 0x4c8   : > { %p4563_p0 = scmp.ge.s32.totalorder %s3423_s20, 2 }
 0x4cd   : > { %s2266_s17 = sand.u32 1, %s4560_s14   ;;  %p4562_p7 = scmp.ne.s32.totalorder %s4561_s4, 0 }
 0x4ce   : > { %s2267_s15 = scalar_lea.sflag [#allocation8], %s2266_s17 }
 0x4cf   : > { %p2950_p13 = pnand %p4563_p0, %p4562_p7 }
 0x4d1   : > { %3406 = dma.done.wait (!%p2950_p13), %s2267_s15, 1024  }
 0x4d2   : > { %3408 = vsyncadd (!%p2950_p13), %s2267_s15, 4294966272  ;;  %s4564_s20 = sld [smem:[#allocation36_spill]]  ;;  %s4565_s16 = sld [smem:[#allocation37_spill]] }
 0x4d3   : > { %s4566_s17 = smov %s3415_s18  ;;  %s4567_s18 = smov %s3419_s19 }
 0x4d8   : > { %p33_p8 = scmp.ge.s32.totalorder %s4564_s20, 4   ;;  %s4568_s19 = smov %s4565_s16 }
 0x4da   :  { %35 = sbr.rel (!%p33_p8) target bundleno = 20 (0x14), region = 178 }
 0x4e1   :  { %2272 = vsyncpa [#allocation7], 1 }
 0x4e2   :  { %2274 = vsyncpa [#allocation7 + $0x1], 1 }
 0x4e3   :  { %2275 = vsyncpa [#allocation10], 1 }
 0x4e4   :  { %2277 = vsyncpa [#allocation10 + $0x1], 1 }
 0x4e5   :  { %2278 = vsyncpa [#allocation13], 1 }
 0x4e6   :  { %2280 = vsyncpa [#allocation13 + $0x1], 1 }
 0x4e7   :  { %2281 = vsyncpa [#allocation16], 1 }
 0x4e8   :  { %2282 = vsyncpa [#allocation19], 1 }
 0x4e9   :  { %2283 = vsyncpa [#allocation22], 1 }
 0x4ea   :  { %2284 = vsyncpa [#allocation8], 1 }
 0x4eb   :  { %2286 = vsyncpa [#allocation8 + $0x1], 1 }

</bundles_post_ra>
